<compile_context>
chip_gen: v6e
topology: v6e:2x2x1
jax: 0.10.0
libtpu: 0.0.40
codegen_flags: <defaults>
</compile_context>

<pallas_src>
import functools

import numpy as np

import jax
import jax.numpy as jnp
from jax.experimental import pallas as pl
from jax.experimental.pallas import tpu as pltpu

LANE = 128
SUBLANE = 8


# ---------------------------------------------------------------- helpers ----
def _round_up(x, m):
    return ((x + m - 1) // m) * m


def _pad2d(x, rows, cols):
    return jnp.pad(x, ((0, rows - x.shape[0]), (0, cols - x.shape[1])))


def _vmem_capacity_bytes():
    try:
        info = pltpu.get_tpu_info()
        cap = int(getattr(info, "vmem_capacity_bytes", 0))
        if cap > 0:
            return cap
    except Exception:
        pass
    return 128 * 2**20  # v5e / v6e default


_VMEM_CAP = _vmem_capacity_bytes()


def _compiler_params(semantics, resident_bytes):
    # Generation-aware scoped-VMEM limit: ask for 2x the resident set, capped at
    # ~60% of physical VMEM (32/64 MiB on v7x, 128 MiB on v5e/v6e), never below
    # the resident set + headroom, never above 90% of physical.
    want = max(2 * resident_bytes, 16 * 2**20)
    limit = min(want, int(0.6 * _VMEM_CAP))
    limit = max(limit, resident_bytes + (4 << 20))
    limit = int(min(limit, int(0.9 * _VMEM_CAP)))
    return pltpu.CompilerParams(dimension_semantics=semantics,
                                vmem_limit_bytes=limit)


def _pick_tile(n):
    # Pick the tile FIRST; N is padded up to a multiple of it afterwards.
    return 256 if n <= 4096 else 512


# ------------------------------------------------------------- XW kernel -----
def _xw_kernel(x_ref, w_ref, o_ref):
    o_ref[...] = jnp.dot(x_ref[...], w_ref[...],
                         preferred_element_type=jnp.float32).astype(jnp.bfloat16)


def _xw_matmul(x_bf16, w_bf16, tile):
    """(N_pad, F_in) bf16 @ (F_in, H_pad) bf16 -> (N_pad, H_pad) bf16."""
    n_pad, f_in = x_bf16.shape
    h_out = w_bf16.shape[1]
    num_i = n_pad // tile
    resident = (2 * tile * f_in * 2 + 2 * f_in * h_out * 2 + 2 * tile * h_out * 2)
    return pl.pallas_call(
        _xw_kernel,
        out_shape=jax.ShapeDtypeStruct((n_pad, h_out), jnp.bfloat16),
        grid_spec=pltpu.PrefetchScalarGridSpec(
            num_scalar_prefetch=0,
            grid=(num_i,),
            in_specs=[pl.BlockSpec((tile, f_in), lambda i: (i, 0)),
                      pl.BlockSpec((f_in, h_out), lambda i: (0, 0))],
            out_specs=pl.BlockSpec((tile, h_out), lambda i: (i, 0))),
        compiler_params=_compiler_params(("parallel",), resident),
    )(x_bf16, w_bf16)


# ----------------------------------------------------- A @ XW aggregation ----
def _agg_kernel(kcols_ref, nnz_ref, a_ref, xw_ref, b_ref, o_ref, acc_ref,
                *, apply_relu, xw_resident, tile, max_nnz):
    i = pl.program_id(0)
    k = pl.program_id(1)

    @pl.when(k == 0)
    def _():
        acc_ref[...] = jnp.zeros_like(acc_ref)

    # Compacted block-sparse loop: k only ranges over (padded) nonzero A blocks.
    @pl.when(k < nnz_ref[i])
    def _():
        if xw_resident:
            kc = kcols_ref[i * max_nnz + k]
            start = pl.multiple_of(kc * tile, tile)
            xw_blk = xw_ref[pl.ds(start, tile), :]
        else:
            xw_blk = xw_ref[...]
        acc_ref[...] += jnp.dot(a_ref[...], xw_blk,
                                preferred_element_type=jnp.float32)

    @pl.when(k == pl.num_programs(1) - 1)
    def _():
        res = acc_ref[...] + b_ref[...]
        if apply_relu:
            res = jnp.maximum(res, 0.0)
        o_ref[...] = res.astype(o_ref.dtype)


def _aggregate(a_bf16, xw_bf16, b_pad, kcols, nnz, tile, max_nnz, apply_relu):
    """A_hat(bf16, block-sparse) @ XW(bf16) + b, optional ReLU -> (N_pad, H_pad) bf16."""
    n_pad = a_bf16.shape[0]
    h_out = xw_bf16.shape[1]
    num_i = n_pad // tile

    # Keep the whole XW operand VMEM-resident when it fits the budget.
    xw_full_bytes = 2 * n_pad * h_out * 2          # double-buffer accounting
    xw_resident = xw_full_bytes <= min(16 * 2**20, _VMEM_CAP // 4)
    if xw_resident:
        xw_spec = pl.BlockSpec((n_pad, h_out), lambda i, k, kc, nz: (0, 0))
        xw_bytes = xw_full_bytes
    else:
        xw_spec = pl.BlockSpec(
            (tile, h_out), lambda i, k, kc, nz: (kc[i * max_nnz + k], 0))
        xw_bytes = 2 * tile * h_out * 2

    resident = (2 * tile * tile * 2        # A tile double-buffer (bf16)
                + xw_bytes                 # XW (resident or per-block, bf16)
                + 2 * h_out * 4            # bias
                + 2 * tile * h_out * 2     # output double-buffer (bf16)
                + tile * h_out * 4)        # f32 accumulator scratch

    kernel = functools.partial(_agg_kernel, apply_relu=apply_relu,
                               xw_resident=xw_resident, tile=tile,
                               max_nnz=max_nnz)
    return pl.pallas_call(
        kernel,
        out_shape=jax.ShapeDtypeStruct((n_pad, h_out), jnp.bfloat16),
        grid_spec=pltpu.PrefetchScalarGridSpec(
            num_scalar_prefetch=2,
            grid=(num_i, max_nnz),
            in_specs=[pl.BlockSpec((tile, tile),
                                   lambda i, k, kc, nz: (i, kc[i * max_nnz + k])),
                      xw_spec,
                      pl.BlockSpec((1, h_out), lambda i, k, kc, nz: (0, 0))],
            out_specs=pl.BlockSpec((tile, h_out), lambda i, k, kc, nz: (i, 0)),
            scratch_shapes=[pltpu.VMEM((tile, h_out), jnp.float32)]),
        compiler_params=_compiler_params(("parallel", "arbitrary"), resident),
    )(kcols, nnz, a_bf16, xw_bf16, b_pad)


# -------------------------------------------------- mean-pool + linear head --
def _head_kernel(p_ref, h_ref, wl_ref, bl_ref, o_ref, acc_ref):
    k = pl.program_id(0)

    @pl.when(k == 0)
    def _():
        acc_ref[...] = jnp.zeros_like(acc_ref)

    acc_ref[...] += jnp.dot(p_ref[...], h_ref[...],
                            preferred_element_type=jnp.float32)

    @pl.when(k == pl.num_programs(0) - 1)
    def _():
        # F.dropout(p=0.5, training=self.training): identity in eval mode.
        # TODO(synk): training-mode dropout (pltpu.prng_*) not wired; eval semantics used.
        o_ref[...] = (jnp.dot(acc_ref[...], wl_ref[...],
                              preferred_element_type=jnp.float32) + bl_ref[...])


def _pool_head(pool_bf16, h_bf16, wl_pad, bl_pad, tile):
    g_pad, n_pad = pool_bf16.shape
    h_dim = h_bf16.shape[1]
    c_pad = wl_pad.shape[1]
    num_k = n_pad // tile
    resident = (2 * g_pad * tile * 2 + 2 * tile * h_dim * 2
                + 2 * h_dim * c_pad * 4 + 2 * c_pad * 4
                + 2 * g_pad * c_pad * 4 + g_pad * h_dim * 4)
    return pl.pallas_call(
        _head_kernel,
        out_shape=jax.ShapeDtypeStruct((g_pad, c_pad), jnp.float32),
        grid_spec=pltpu.PrefetchScalarGridSpec(
            num_scalar_prefetch=0,
            grid=(num_k,),
            in_specs=[pl.BlockSpec((g_pad, tile), lambda k: (0, k)),
                      pl.BlockSpec((tile, h_dim), lambda k: (k, 0)),
                      pl.BlockSpec((h_dim, c_pad), lambda k: (0, 0)),
                      pl.BlockSpec((1, c_pad), lambda k: (0, 0))],
            out_specs=pl.BlockSpec((g_pad, c_pad), lambda k: (0, 0)),
            scratch_shapes=[pltpu.VMEM((g_pad, h_dim), jnp.float32)]),
        compiler_params=_compiler_params(("arbitrary",), resident),
    )(pool_bf16, h_bf16, wl_pad, bl_pad)


# ------------------------------------------------------------ full forward ---
@jax.jit
def gcn_forward(a_bf16, kcols, nnz, x, params, pool_bf16):
    """3x (XW -> block-sparse A_hat@XW + b [+relu]) -> mean-pool -> linear.

    a_bf16:   (N_pad, N_pad) bf16, zero-padded normalized adjacency.
    kcols:    (num_blk * max_nnz,) int32, compacted nonzero block columns.
    nnz:      (num_blk,) int32, nonzero block count per row tile.
    pool_bf16:(G_pad, N_pad) bf16 mean-pool matrix (padded cols/rows are zero).
    Returns padded logits (G_pad, C_pad) f32; caller slices [:G, :C].
    """
    w1, b1, w2, b2, w3, b3, wl, bl = params
    n, f0 = x.shape
    n_pad = a_bf16.shape[0]
    num_blk = nnz.shape[0]
    tile = n_pad // num_blk
    max_nnz = kcols.shape[0] // num_blk
    hdim = w1.shape[1]
    c = wl.shape[1]

    f_pad = _round_up(f0, LANE)
    h_pad = _round_up(hdim, LANE)
    c_pad = _round_up(c, LANE)

    # --- padding / dtype staging (layout plumbing only) ---
    x_pad = _pad2d(x, n_pad, f_pad).astype(jnp.bfloat16)
    w1p = _pad2d(w1, f_pad, h_pad).astype(jnp.bfloat16)
    w2p = _pad2d(w2, h_pad, h_pad).astype(jnp.bfloat16)
    w3p = _pad2d(w3, h_pad, h_pad).astype(jnp.bfloat16)
    b1p = _pad2d(b1, 1, h_pad)
    b2p = _pad2d(b2, 1, h_pad)
    b3p = _pad2d(b3, 1, h_pad)
    wlp = _pad2d(wl, h_pad, c_pad)
    blp = _pad2d(bl, 1, c_pad)

    # NOTE: padded rows of h hold relu(bias) (A's padded rows are zero); this is
    # safe only because pool's padded columns are zero — do not consume h rows >= n.
    h = x_pad
    for w, b, relu in ((w1p, b1p, True), (w2p, b2p, True), (w3p, b3p, False)):
        xw = _xw_matmul(h, w, tile)                                   # bf16
        h = _aggregate(a_bf16, xw, b, kcols, nnz, tile, max_nnz, relu)  # bf16

    return _pool_head(pool_bf16, h, wlp, blp, tile)


# ---------------------------------------------------------- graph plumbing ---
def build_normalized_adjacency(edge_index, num_nodes):
    """Dense D^{-1/2} (A + I) D^{-1/2} from a (2, E) edge_index."""
    src, dst = edge_index[0], edge_index[1]
    a = jnp.zeros((num_nodes, num_nodes), jnp.float32)
    a = a.at[dst, src].add(1.0)
    a = a + jnp.eye(num_nodes, dtype=jnp.float32)
    deg = a.sum(axis=1)
    d_inv_sqrt = jnp.where(deg > 0, 1.0 / jnp.sqrt(jnp.maximum(deg, 1e-12)), 0.0)
    return d_inv_sqrt[:, None] * a * d_inv_sqrt[None, :]


def build_pool_matrix(batch, num_graphs):
    """(G, N) matrix computing the per-graph mean of node features."""
    onehot = (batch[None, :] == jnp.arange(num_graphs)[:, None]).astype(jnp.float32)
    counts = onehot.sum(axis=1, keepdims=True)
    return onehot / jnp.maximum(counts, 1.0)


def prepare_graph(a_hat, pool_mat):
    """Host-side preprocessing: pad A / pool, build compacted block sparsity.

    Runs on host (numpy) because max_nnz must be a static grid extent.
    """
    n = a_hat.shape[0]
    tile = _pick_tile(n)
    n_pad = _round_up(n, tile)

    a_np = np.zeros((n_pad, n_pad), np.float32)
    a_np[:n, :n] = np.asarray(a_hat)
    num_blk = n_pad // tile
    blk_nz = (np.abs(a_np).reshape(num_blk, tile, num_blk, tile)
              .sum(axis=(1, 3)) > 0)
    nnz = blk_nz.sum(axis=1).astype(np.int32)
    max_nnz = max(int(nnz.max()), 1)
    kcols = np.zeros((num_blk, max_nnz), np.int32)
    for i in range(num_blk):
        cols = np.nonzero(blk_nz[i])[0].astype(np.int32)
        if cols.size:
            kcols[i, :cols.size] = cols
            kcols[i, cols.size:] = cols[-1]   # repeat last valid idx -> DMA dedupe

    g = pool_mat.shape[0]
    g_pad = _round_up(max(g, SUBLANE), SUBLANE)
    pool_np = np.zeros((g_pad, n_pad), np.float32)
    pool_np[:g, :n] = np.asarray(pool_mat)

    return (jnp.asarray(a_np, jnp.bfloat16),
            jnp.asarray(kcols.reshape(-1)),
            jnp.asarray(nnz),
            jnp.asarray(pool_np, jnp.bfloat16))


def init_params(key, num_node_features, hidden_channels, num_classes):
    """Deterministic glorot-ish init matching the module's parameter shapes."""
    ks = jax.random.split(key, 4)

    def glorot(k, fan_in, fan_out):
        limit = jnp.sqrt(6.0 / (fan_in + fan_out))
        return jax.random.uniform(k, (fan_in, fan_out), jnp.float32, -limit, limit)

    w1 = glorot(ks[0], num_node_features, hidden_channels)
    b1 = jnp.zeros((1, hidden_channels), jnp.float32)
    w2 = glorot(ks[1], hidden_channels, hidden_channels)
    b2 = jnp.zeros((1, hidden_channels), jnp.float32)
    w3 = glorot(ks[2], hidden_channels, hidden_channels)
    b3 = jnp.zeros((1, hidden_channels), jnp.float32)
    wl = glorot(ks[3], hidden_channels, num_classes)
    bl = jnp.zeros((1, num_classes), jnp.float32)
    return (w1, b1, w2, b2, w3, b3, wl, bl)


def gcn_reference(a_hat, x, params, pool_mat):
    """Pure-JAX f32 reference of the module's forward (eval mode)."""
    w1, b1, w2, b2, w3, b3, wl, bl = params
    h = jnp.maximum(a_hat @ (x @ w1) + b1, 0.0)
    h = jnp.maximum(a_hat @ (h @ w2) + b2, 0.0)
    h = a_hat @ (h @ w3) + b3
    pooled = pool_mat @ h
    return pooled @ wl + bl


# ------------------------------------------------------------------- main ----
if __name__ == "__main__":
    key = jax.random.PRNGKey(0)

    # Small synthetic graph batch: 2 graphs of 8 nodes each (16 nodes total).
    N = 16                 # total nodes
    F0 = 4                 # dataset.num_node_features
    H = 32                 # hidden_channels
    G = 2                  # number of graphs in the batch
    C = 4                  # dataset.num_classes

    # Undirected ring within each graph (edges stored in both directions).
    srcs, dsts = [], []
    for g in range(G):
        base = g * (N // G)
        n_g = N // G
        for i in range(n_g):
            u = base + i
            v = base + (i + 1) % n_g
            srcs += [u, v]
            dsts += [v, u]
    edge_index = jnp.array([srcs, dsts], dtype=jnp.int32)        # (2, E)
    batch = jnp.repeat(jnp.arange(G, dtype=jnp.int32), N // G)   # (N,)

    k_x, k_p = jax.random.split(key)
    x = jax.random.normal(k_x, (N, F0), jnp.float32)
    params = init_params(k_p, F0, H, C)

    a_hat = build_normalized_adjacency(edge_index, N)
    pool_mat = build_pool_matrix(batch, G)

    a_bf16, kcols, nnz, pool_bf16 = prepare_graph(a_hat, pool_mat)

    out_pad = gcn_forward(a_bf16, kcols, nnz, x, params, pool_bf16)
    out_pad = jax.block_until_ready(out_pad)
    out = out_pad[:G, :C]
    assert out.shape == (G, C)

    ref = gcn_reference(a_hat, x, params, pool_mat)
    assert jnp.allclose(out, ref, rtol=5e-2, atol=5e-2), (
        f"mismatch: max abs diff {jnp.max(jnp.abs(out - ref))}")

    print("KERNEL_OK")
</pallas_src>

<mosaic_0001>
module attributes {stable_mosaic.version = 11 : i64} {
  func.func @_xw_kernel(%arg0: i32, %arg1: memref<256x128xbf16, #tpu.memory_space<vmem>>, %arg2: memref<128x128xbf16, #tpu.memory_space<vmem>>, %arg3: memref<256x128xbf16, #tpu.memory_space<vmem>>) attributes {dimension_semantics = [#tpu.dimension_semantics<parallel>], iteration_bounds = array<i64: 1>, scalar_prefetch = 0 : i64, scratch_operands = 0 : i64, tpu.core_type = #tpu.core_type<tc>, window_params = [{transform_indices = @transform_0, window_bounds = array<i64: 256, 128>}, {pipeline_mode = #tpu.pipeline_mode<synchronous>, transform_indices = @transform_1, window_bounds = array<i64: 128, 128>}, {transform_indices = @transform_2, window_bounds = array<i64: 256, 128>}]} {
    %c0 = arith.constant 0 : index
    %c0_0 = arith.constant 0 : index
    %0 = vector.load %arg1[%c0, %c0_0] : memref<256x128xbf16, #tpu.memory_space<vmem>>, vector<256x128xbf16>
    %c0_1 = arith.constant 0 : index
    %c0_2 = arith.constant 0 : index
    %1 = vector.load %arg2[%c0_1, %c0_2] : memref<128x128xbf16, #tpu.memory_space<vmem>>, vector<128x128xbf16>
    %cst = arith.constant dense<0.000000e+00> : vector<256x128xf32>
    %2 = tpu.matmul %0, %1, %cst {dimension_numbers = #tpu.dot_dimension_numbers<[1], [0], [0], [1], [0, 0, 1, 1], [], []>} : vector<256x128xbf16>, vector<128x128xbf16>, vector<256x128xf32> -> vector<256x128xf32>
    %3 = arith.truncf %2 : vector<256x128xf32> to vector<256x128xbf16>
    %c0_3 = arith.constant 0 : index
    %c0_4 = arith.constant 0 : index
    %4 = vector.load %arg3[%c0_3, %c0_4] : memref<256x128xbf16, #tpu.memory_space<vmem>>, vector<256x128xbf16>
    tpu.vector_store %arg3[%c0_3, %c0_4], %3 {strides = array<i32>} : memref<256x128xbf16, #tpu.memory_space<vmem>>, vector<256x128xbf16>,
    return
  }
  func.func @transform_0(%arg0: i32) -> (i32, i32) {
    %c0_i32 = arith.constant 0 : i32
    %c0_i32_0 = arith.constant 0 : i32
    return %arg0, %c0_i32 : i32, i32
  }
  func.func @transform_1(%arg0: i32) -> (i32, i32) {
    %c0_i32 = arith.constant 0 : i32
    %c0_i32_0 = arith.constant 0 : i32
    %c0_i32_1 = arith.constant 0 : i32
    return %c0_i32, %c0_i32_0 : i32, i32
  }
  func.func @transform_2(%arg0: i32) -> (i32, i32) {
    %c0_i32 = arith.constant 0 : i32
    %c0_i32_0 = arith.constant 0 : i32
    return %arg0, %c0_i32 : i32, i32
  }
}

module attributes {stable_mosaic.version = 11 : i64} {
  func.func @_agg_kernel(%arg0: i32, %arg1: i32, %arg2: memref<1xi32, #tpu.memory_space<smem>>, %arg3: memref<1xi32, #tpu.memory_space<smem>>, %arg4: memref<256x256xbf16, #tpu.memory_space<vmem>>, %arg5: memref<256x128xbf16, #tpu.memory_space<vmem>>, %arg6: memref<1x128xf32, #tpu.memory_space<vmem>>, %arg7: memref<256x128xbf16, #tpu.memory_space<vmem>>, %arg8: memref<256x128xf32, #tpu.memory_space<vmem>>) attributes {dimension_semantics = [#tpu.dimension_semantics<parallel>, #tpu.dimension_semantics<arbitrary>], iteration_bounds = array<i64: 1, 1>, scalar_prefetch = 2 : i64, scratch_operands = 1 : i64, tpu.core_type = #tpu.core_type<tc>, window_params = [{transform_indices = @transform_0, window_bounds = array<i64: 256, 256>}, {pipeline_mode = #tpu.pipeline_mode<synchronous>, transform_indices = @transform_1, window_bounds = array<i64: 256, 128>}, {pipeline_mode = #tpu.pipeline_mode<synchronous>, transform_indices = @transform_2, window_bounds = array<i64: 1, 128>}, {transform_indices = @transform_3, window_bounds = array<i64: 256, 128>}]} {
    %c0_i32 = arith.constant 0 : i32
    %0 = arith.cmpi eq, %arg1, %c0_i32 : i32
    %1 = arith.extui %0 : i1 to i32
    %c0_i32_0 = arith.constant 0 : i32
    %2 = arith.cmpi ne, %1, %c0_i32_0 : i32
    scf.if %2 {
      %cst = arith.constant 0.000000e+00 : f32
      %11 = vector.broadcast %cst : f32 to vector<256x128xf32>
      %c0 = arith.constant 0 : index
      %c0_4 = arith.constant 0 : index
      %12 = vector.load %arg8[%c0, %c0_4] : memref<256x128xf32, #tpu.memory_space<vmem>>, vector<256x128xf32>
      tpu.vector_store %arg8[%c0, %c0_4], %11 {strides = array<i32>} : memref<256x128xf32, #tpu.memory_space<vmem>>, vector<256x128xf32>,
    } else {
    }
    %3 = arith.index_cast %arg0 : i32 to index
    %4 = memref.load %arg3[%3] : memref<1xi32, #tpu.memory_space<smem>>
    %5 = arith.cmpi slt, %arg1, %4 : i32
    %6 = arith.extui %5 : i1 to i32
    %c0_i32_1 = arith.constant 0 : i32
    %7 = arith.cmpi ne, %6, %c0_i32_1 : i32
    scf.if %7 {
      %c1_i32 = arith.constant 1 : i32
      %11 = arith.muli %arg0, %c1_i32 : i32
      %12 = arith.addi %11, %arg1 : i32
      %13 = arith.index_cast %12 : i32 to index
      %14 = memref.load %arg2[%13] : memref<1xi32, #tpu.memory_space<smem>>
      %c256_i32 = arith.constant 256 : i32
      %15 = arith.muli %14, %c256_i32 : i32
      %16 = tpu.assume_multiple %15, 256 : i32
      %17 = arith.index_cast %16 : i32 to index
      %c0 = arith.constant 0 : index
      %18 = vector.load %arg5[%17, %c0] : memref<256x128xbf16, #tpu.memory_space<vmem>>, vector<256x128xbf16>
      %c0_4 = arith.constant 0 : index
      %c0_5 = arith.constant 0 : index
      %19 = vector.load %arg8[%c0_4, %c0_5] : memref<256x128xf32, #tpu.memory_space<vmem>>, vector<256x128xf32>
      %c0_6 = arith.constant 0 : index
      %c0_7 = arith.constant 0 : index
      %20 = vector.load %arg4[%c0_6, %c0_7] : memref<256x256xbf16, #tpu.memory_space<vmem>>, vector<256x256xbf16>
      %cst = arith.constant dense<0.000000e+00> : vector<256x128xf32>
      %21 = tpu.matmul %20, %18, %cst {dimension_numbers = #tpu.dot_dimension_numbers<[1], [0], [0], [1], [0, 0, 1, 1], [], []>} : vector<256x256xbf16>, vector<256x128xbf16>, vector<256x128xf32> -> vector<256x128xf32>
      %22 = arith.addf %19, %21 : vector<256x128xf32>
      %c0_8 = arith.constant 0 : index
      %c0_9 = arith.constant 0 : index
      %23 = vector.load %arg8[%c0_8, %c0_9] : memref<256x128xf32, #tpu.memory_space<vmem>>, vector<256x128xf32>
      tpu.vector_store %arg8[%c0_8, %c0_9], %22 {strides = array<i32>} : memref<256x128xf32, #tpu.memory_space<vmem>>, vector<256x128xf32>,
    } else {
    }
    %c0_i32_2 = arith.constant 0 : i32
    %8 = arith.cmpi eq, %arg1, %c0_i32_2 : i32
    %9 = arith.extui %8 : i1 to i32
    %c0_i32_3 = arith.constant 0 : i32
    %10 = arith.cmpi ne, %9, %c0_i32_3 : i32
    scf.if %10 {
      %c0 = arith.constant 0 : index
      %c0_4 = arith.constant 0 : index
      %11 = vector.load %arg8[%c0, %c0_4] : memref<256x128xf32, #tpu.memory_space<vmem>>, vector<256x128xf32>
      %c0_5 = arith.constant 0 : index
      %c0_6 = arith.constant 0 : index
      %12 = vector.load %arg6[%c0_5, %c0_6] : memref<1x128xf32, #tpu.memory_space<vmem>>, vector<1x128xf32>
      %13 = vector.broadcast %12 : vector<1x128xf32> to vector<256x128xf32>
      %14 = arith.addf %11, %13 : vector<256x128xf32>
      %15 = arith.truncf %14 : vector<256x128xf32> to vector<256x128xbf16>
      %c0_7 = arith.constant 0 : index
      %c0_8 = arith.constant 0 : index
      %16 = vector.load %arg7[%c0_7, %c0_8] : memref<256x128xbf16, #tpu.memory_space<vmem>>, vector<256x128xbf16>
      tpu.vector_store %arg7[%c0_7, %c0_8], %15 {strides = array<i32>} : memref<256x128xbf16, #tpu.memory_space<vmem>>, vector<256x128xbf16>,
    } else {
    }
    return
  }
  func.func @transform_0(%arg0: i32, %arg1: i32, %arg2: memref<1xi32, #tpu.memory_space<smem>>, %arg3: memref<1xi32, #tpu.memory_space<smem>>) -> (i32, i32) {
    %c1_i32 = arith.constant 1 : i32
    %0 = arith.muli %arg0, %c1_i32 : i32
    %1 = arith.addi %0, %arg1 : i32
    %2 = arith.index_cast %1 : i32 to index
    %3 = memref.load %arg2[%2] : memref<1xi32, #tpu.memory_space<smem>>
    %c0_i32 = arith.constant 0 : i32
    return %arg0, %3 : i32, i32
  }
  func.func @transform_1(%arg0: i32, %arg1: i32, %arg2: memref<1xi32, #tpu.memory_space<smem>>, %arg3: memref<1xi32, #tpu.memory_space<smem>>) -> (i32, i32) {
    %c0_i32 = arith.constant 0 : i32
    %c0_i32_0 = arith.constant 0 : i32
    %c0_i32_1 = arith.constant 0 : i32
    return %c0_i32, %c0_i32_0 : i32, i32
  }
  func.func @transform_2(%arg0: i32, %arg1: i32, %arg2: memref<1xi32, #tpu.memory_space<smem>>, %arg3: memref<1xi32, #tpu.memory_space<smem>>) -> (i32, i32) {
    %c0_i32 = arith.constant 0 : i32
    %c0_i32_0 = arith.constant 0 : i32
    %c0_i32_1 = arith.constant 0 : i32
    return %c0_i32, %c0_i32_0 : i32, i32
  }
  func.func @transform_3(%arg0: i32, %arg1: i32, %arg2: memref<1xi32, #tpu.memory_space<smem>>, %arg3: memref<1xi32, #tpu.memory_space<smem>>) -> (i32, i32) {
    %c0_i32 = arith.constant 0 : i32
    %c0_i32_0 = arith.constant 0 : i32
    return %arg0, %c0_i32 : i32, i32
  }
}

module attributes {stable_mosaic.version = 11 : i64} {
  func.func @_agg_kernel(%arg0: i32, %arg1: i32, %arg2: memref<1xi32, #tpu.memory_space<smem>>, %arg3: memref<1xi32, #tpu.memory_space<smem>>, %arg4: memref<256x256xbf16, #tpu.memory_space<vmem>>, %arg5: memref<256x128xbf16, #tpu.memory_space<vmem>>, %arg6: memref<1x128xf32, #tpu.memory_space<vmem>>, %arg7: memref<256x128xbf16, #tpu.memory_space<vmem>>, %arg8: memref<256x128xf32, #tpu.memory_space<vmem>>) attributes {dimension_semantics = [#tpu.dimension_semantics<parallel>, #tpu.dimension_semantics<arbitrary>], iteration_bounds = array<i64: 1, 1>, scalar_prefetch = 2 : i64, scratch_operands = 1 : i64, tpu.core_type = #tpu.core_type<tc>, window_params = [{transform_indices = @transform_0, window_bounds = array<i64: 256, 256>}, {pipeline_mode = #tpu.pipeline_mode<synchronous>, transform_indices = @transform_1, window_bounds = array<i64: 256, 128>}, {pipeline_mode = #tpu.pipeline_mode<synchronous>, transform_indices = @transform_2, window_bounds = array<i64: 1, 128>}, {transform_indices = @transform_3, window_bounds = array<i64: 256, 128>}]} {
    %c0_i32 = arith.constant 0 : i32
    %0 = arith.cmpi eq, %arg1, %c0_i32 : i32
    %1 = arith.extui %0 : i1 to i32
    %c0_i32_0 = arith.constant 0 : i32
    %2 = arith.cmpi ne, %1, %c0_i32_0 : i32
    scf.if %2 {
      %cst = arith.constant 0.000000e+00 : f32
      %11 = vector.broadcast %cst : f32 to vector<256x128xf32>
      %c0 = arith.constant 0 : index
      %c0_4 = arith.constant 0 : index
      %12 = vector.load %arg8[%c0, %c0_4] : memref<256x128xf32, #tpu.memory_space<vmem>>, vector<256x128xf32>
      tpu.vector_store %arg8[%c0, %c0_4], %11 {strides = array<i32>} : memref<256x128xf32, #tpu.memory_space<vmem>>, vector<256x128xf32>,
    } else {
    }
    %3 = arith.index_cast %arg0 : i32 to index
    %4 = memref.load %arg3[%3] : memref<1xi32, #tpu.memory_space<smem>>
    %5 = arith.cmpi slt, %arg1, %4 : i32
    %6 = arith.extui %5 : i1 to i32
    %c0_i32_1 = arith.constant 0 : i32
    %7 = arith.cmpi ne, %6, %c0_i32_1 : i32
    scf.if %7 {
      %c1_i32 = arith.constant 1 : i32
      %11 = arith.muli %arg0, %c1_i32 : i32
      %12 = arith.addi %11, %arg1 : i32
      %13 = arith.index_cast %12 : i32 to index
      %14 = memref.load %arg2[%13] : memref<1xi32, #tpu.memory_space<smem>>
      %c256_i32 = arith.constant 256 : i32
      %15 = arith.muli %14, %c256_i32 : i32
      %16 = tpu.assume_multiple %15, 256 : i32
      %17 = arith.index_cast %16 : i32 to index
      %c0 = arith.constant 0 : index
      %18 = vector.load %arg5[%17, %c0] : memref<256x128xbf16, #tpu.memory_space<vmem>>, vector<256x128xbf16>
      %c0_4 = arith.constant 0 : index
      %c0_5 = arith.constant 0 : index
      %19 = vector.load %arg8[%c0_4, %c0_5] : memref<256x128xf32, #tpu.memory_space<vmem>>, vector<256x128xf32>
      %c0_6 = arith.constant 0 : index
      %c0_7 = arith.constant 0 : index
      %20 = vector.load %arg4[%c0_6, %c0_7] : memref<256x256xbf16, #tpu.memory_space<vmem>>, vector<256x256xbf16>
      %cst = arith.constant dense<0.000000e+00> : vector<256x128xf32>
      %21 = tpu.matmul %20, %18, %cst {dimension_numbers = #tpu.dot_dimension_numbers<[1], [0], [0], [1], [0, 0, 1, 1], [], []>} : vector<256x256xbf16>, vector<256x128xbf16>, vector<256x128xf32> -> vector<256x128xf32>
      %22 = arith.addf %19, %21 : vector<256x128xf32>
      %c0_8 = arith.constant 0 : index
      %c0_9 = arith.constant 0 : index
      %23 = vector.load %arg8[%c0_8, %c0_9] : memref<256x128xf32, #tpu.memory_space<vmem>>, vector<256x128xf32>
      tpu.vector_store %arg8[%c0_8, %c0_9], %22 {strides = array<i32>} : memref<256x128xf32, #tpu.memory_space<vmem>>, vector<256x128xf32>,
    } else {
    }
    %c0_i32_2 = arith.constant 0 : i32
    %8 = arith.cmpi eq, %arg1, %c0_i32_2 : i32
    %9 = arith.extui %8 : i1 to i32
    %c0_i32_3 = arith.constant 0 : i32
    %10 = arith.cmpi ne, %9, %c0_i32_3 : i32
    scf.if %10 {
      %c0 = arith.constant 0 : index
      %c0_4 = arith.constant 0 : index
      %11 = vector.load %arg8[%c0, %c0_4] : memref<256x128xf32, #tpu.memory_space<vmem>>, vector<256x128xf32>
      %c0_5 = arith.constant 0 : index
      %c0_6 = arith.constant 0 : index
      %12 = vector.load %arg6[%c0_5, %c0_6] : memref<1x128xf32, #tpu.memory_space<vmem>>, vector<1x128xf32>
      %13 = vector.broadcast %12 : vector<1x128xf32> to vector<256x128xf32>
      %14 = arith.addf %11, %13 : vector<256x128xf32>
      %cst = arith.constant 0.000000e+00 : f32
      %15 = vector.broadcast %cst : f32 to vector<256x128xf32>
      %16 = arith.maximumf %14, %15 : vector<256x128xf32>
      %17 = arith.truncf %16 : vector<256x128xf32> to vector<256x128xbf16>
      %c0_7 = arith.constant 0 : index
      %c0_8 = arith.constant 0 : index
      %18 = vector.load %arg7[%c0_7, %c0_8] : memref<256x128xbf16, #tpu.memory_space<vmem>>, vector<256x128xbf16>
      tpu.vector_store %arg7[%c0_7, %c0_8], %17 {strides = array<i32>} : memref<256x128xbf16, #tpu.memory_space<vmem>>, vector<256x128xbf16>,
    } else {
    }
    return
  }
  func.func @transform_0(%arg0: i32, %arg1: i32, %arg2: memref<1xi32, #tpu.memory_space<smem>>, %arg3: memref<1xi32, #tpu.memory_space<smem>>) -> (i32, i32) {
    %c1_i32 = arith.constant 1 : i32
    %0 = arith.muli %arg0, %c1_i32 : i32
    %1 = arith.addi %0, %arg1 : i32
    %2 = arith.index_cast %1 : i32 to index
    %3 = memref.load %arg2[%2] : memref<1xi32, #tpu.memory_space<smem>>
    %c0_i32 = arith.constant 0 : i32
    return %arg0, %3 : i32, i32
  }
  func.func @transform_1(%arg0: i32, %arg1: i32, %arg2: memref<1xi32, #tpu.memory_space<smem>>, %arg3: memref<1xi32, #tpu.memory_space<smem>>) -> (i32, i32) {
    %c0_i32 = arith.constant 0 : i32
    %c0_i32_0 = arith.constant 0 : i32
    %c0_i32_1 = arith.constant 0 : i32
    return %c0_i32, %c0_i32_0 : i32, i32
  }
  func.func @transform_2(%arg0: i32, %arg1: i32, %arg2: memref<1xi32, #tpu.memory_space<smem>>, %arg3: memref<1xi32, #tpu.memory_space<smem>>) -> (i32, i32) {
    %c0_i32 = arith.constant 0 : i32
    %c0_i32_0 = arith.constant 0 : i32
    %c0_i32_1 = arith.constant 0 : i32
    return %c0_i32, %c0_i32_0 : i32, i32
  }
  func.func @transform_3(%arg0: i32, %arg1: i32, %arg2: memref<1xi32, #tpu.memory_space<smem>>, %arg3: memref<1xi32, #tpu.memory_space<smem>>) -> (i32, i32) {
    %c0_i32 = arith.constant 0 : i32
    %c0_i32_0 = arith.constant 0 : i32
    return %arg0, %c0_i32 : i32, i32
  }
}

module attributes {stable_mosaic.version = 11 : i64} {
  func.func @_head_kernel(%arg0: i32, %arg1: memref<8x256xbf16, #tpu.memory_space<vmem>>, %arg2: memref<256x128xbf16, #tpu.memory_space<vmem>>, %arg3: memref<128x128xf32, #tpu.memory_space<vmem>>, %arg4: memref<1x128xf32, #tpu.memory_space<vmem>>, %arg5: memref<8x128xf32, #tpu.memory_space<vmem>>, %arg6: memref<8x128xf32, #tpu.memory_space<vmem>>) attributes {dimension_semantics = [#tpu.dimension_semantics<arbitrary>], iteration_bounds = array<i64: 1>, scalar_prefetch = 0 : i64, scratch_operands = 1 : i64, tpu.core_type = #tpu.core_type<tc>, window_params = [{transform_indices = @transform_0, window_bounds = array<i64: 8, 256>}, {transform_indices = @transform_1, window_bounds = array<i64: 256, 128>}, {pipeline_mode = #tpu.pipeline_mode<synchronous>, transform_indices = @transform_2, window_bounds = array<i64: 128, 128>}, {pipeline_mode = #tpu.pipeline_mode<synchronous>, transform_indices = @transform_3, window_bounds = array<i64: 1, 128>}, {pipeline_mode = #tpu.pipeline_mode<synchronous>, transform_indices = @transform_4, window_bounds = array<i64: 8, 128>}]} {
    %c0_i32 = arith.constant 0 : i32
    %0 = arith.cmpi eq, %arg0, %c0_i32 : i32
    %1 = arith.extui %0 : i1 to i32
    %c0_i32_0 = arith.constant 0 : i32
    %2 = arith.cmpi ne, %1, %c0_i32_0 : i32
    scf.if %2 {
      %cst_10 = arith.constant 0.000000e+00 : f32
      %12 = vector.broadcast %cst_10 : f32 to vector<8x128xf32>
      %c0_11 = arith.constant 0 : index
      %c0_12 = arith.constant 0 : index
      %13 = vector.load %arg6[%c0_11, %c0_12] : memref<8x128xf32, #tpu.memory_space<vmem>>, vector<8x128xf32>
      tpu.vector_store %arg6[%c0_11, %c0_12], %12 {strides = array<i32>} : memref<8x128xf32, #tpu.memory_space<vmem>>, vector<8x128xf32>,
    } else {
    }
    %c0 = arith.constant 0 : index
    %c0_1 = arith.constant 0 : index
    %3 = vector.load %arg6[%c0, %c0_1] : memref<8x128xf32, #tpu.memory_space<vmem>>, vector<8x128xf32>
    %c0_2 = arith.constant 0 : index
    %c0_3 = arith.constant 0 : index
    %4 = vector.load %arg1[%c0_2, %c0_3] : memref<8x256xbf16, #tpu.memory_space<vmem>>, vector<8x256xbf16>
    %c0_4 = arith.constant 0 : index
    %c0_5 = arith.constant 0 : index
    %5 = vector.load %arg2[%c0_4, %c0_5] : memref<256x128xbf16, #tpu.memory_space<vmem>>, vector<256x128xbf16>
    %cst = arith.constant dense<0.000000e+00> : vector<8x128xf32>
    %6 = tpu.matmul %4, %5, %cst {dimension_numbers = #tpu.dot_dimension_numbers<[1], [0], [0], [1], [0, 0, 1, 1], [], []>} : vector<8x256xbf16>, vector<256x128xbf16>, vector<8x128xf32> -> vector<8x128xf32>
    %7 = arith.addf %3, %6 : vector<8x128xf32>
    %c0_6 = arith.constant 0 : index
    %c0_7 = arith.constant 0 : index
    %8 = vector.load %arg6[%c0_6, %c0_7] : memref<8x128xf32, #tpu.memory_space<vmem>>, vector<8x128xf32>
    tpu.vector_store %arg6[%c0_6, %c0_7], %7 {strides = array<i32>} : memref<8x128xf32, #tpu.memory_space<vmem>>, vector<8x128xf32>,
    %c0_i32_8 = arith.constant 0 : i32
    %9 = arith.cmpi eq, %arg0, %c0_i32_8 : i32
    %10 = arith.extui %9 : i1 to i32
    %c0_i32_9 = arith.constant 0 : i32
    %11 = arith.cmpi ne, %10, %c0_i32_9 : i32
    scf.if %11 {
      %c0_10 = arith.constant 0 : index
      %c0_11 = arith.constant 0 : index
      %12 = vector.load %arg6[%c0_10, %c0_11] : memref<8x128xf32, #tpu.memory_space<vmem>>, vector<8x128xf32>
      %c0_12 = arith.constant 0 : index
      %c0_13 = arith.constant 0 : index
      %13 = vector.load %arg3[%c0_12, %c0_13] : memref<128x128xf32, #tpu.memory_space<vmem>>, vector<128x128xf32>
      %cst_14 = arith.constant dense<0.000000e+00> : vector<8x128xf32>
      %14 = tpu.matmul %12, %13, %cst_14 {dimension_numbers = #tpu.dot_dimension_numbers<[1], [0], [0], [1], [0, 0, 1, 1], [], []>} : vector<8x128xf32>, vector<128x128xf32>, vector<8x128xf32> -> vector<8x128xf32>
      %c0_15 = arith.constant 0 : index
      %c0_16 = arith.constant 0 : index
      %15 = vector.load %arg4[%c0_15, %c0_16] : memref<1x128xf32, #tpu.memory_space<vmem>>, vector<1x128xf32>
      %16 = vector.broadcast %15 : vector<1x128xf32> to vector<8x128xf32>
      %17 = arith.addf %14, %16 : vector<8x128xf32>
      %c0_17 = arith.constant 0 : index
      %c0_18 = arith.constant 0 : index
      %18 = vector.load %arg5[%c0_17, %c0_18] : memref<8x128xf32, #tpu.memory_space<vmem>>, vector<8x128xf32>
      tpu.vector_store %arg5[%c0_17, %c0_18], %17 {strides = array<i32>} : memref<8x128xf32, #tpu.memory_space<vmem>>, vector<8x128xf32>,
    } else {
    }
    return
  }
  func.func @transform_0(%arg0: i32) -> (i32, i32) {
    %c0_i32 = arith.constant 0 : i32
    %c0_i32_0 = arith.constant 0 : i32
    return %c0_i32, %arg0 : i32, i32
  }
  func.func @transform_1(%arg0: i32) -> (i32, i32) {
    %c0_i32 = arith.constant 0 : i32
    %c0_i32_0 = arith.constant 0 : i32
    return %arg0, %c0_i32 : i32, i32
  }
  func.func @transform_2(%arg0: i32) -> (i32, i32) {
    %c0_i32 = arith.constant 0 : i32
    %c0_i32_0 = arith.constant 0 : i32
    %c0_i32_1 = arith.constant 0 : i32
    return %c0_i32, %c0_i32_0 : i32, i32
  }
  func.func @transform_3(%arg0: i32) -> (i32, i32) {
    %c0_i32 = arith.constant 0 : i32
    %c0_i32_0 = arith.constant 0 : i32
    %c0_i32_1 = arith.constant 0 : i32
    return %c0_i32, %c0_i32_0 : i32, i32
  }
  func.func @transform_4(%arg0: i32) -> (i32, i32) {
    %c0_i32 = arith.constant 0 : i32
    %c0_i32_0 = arith.constant 0 : i32
    %c0_i32_1 = arith.constant 0 : i32
    return %c0_i32, %c0_i32_0 : i32, i32
  }
}

</mosaic_0001>

<bundles_post_ra>
// kernel: gcn_forward.13
= control target key start
LH: loop header
LB: loop body
LE: loop exit
PB: predicated region body
PF: predicated region fallthrough
CT: control target
= control target key end

     0   :  { %v451_v2 = vmov 0.0   ;;  %s601_s0 = inlined_call_operand.vmem [shape: bf16[8,256], index: 0, kind: input, shape index: {}]   ;;  %s602_s1 = inlined_call_operand.vmem [shape: bf16[256,128], index: 1, kind: input, shape index: {}]   ;;  %s603_s2 = inlined_call_operand.vmem [shape: f32[128,128], index: 2, kind: input, shape index: {}]   ;;  %s604_s3 = inlined_call_operand.vmem [shape: f32[1,128], index: 3, kind: input, shape index: {}]   ;;  %s605_s4 = inlined_call_operand.hbm [shape: f32[8,128], index: 4, kind: output, shape index: {}]  }
   0x1   :  { %v411_v0 = vld [vmem:[%s602_s1 + $0x78] sm:$0xff]   ;;  %373 = vmatprep.subr.mxu1 %v451_v2  ;;  %v413_v3 = vld [vmem:[%s602_s1 + $0x70] sm:$0xff]   ;;  %v415_v5 = vld [vmem:[%s602_s1 + $0x68] sm:$0xff]  }
   0x2   :  { %v412_v1 = vld [vmem:[%s602_s1 + $0x38] sm:$0xff]   ;;  %334 = vmatprep.subr.bf16.mxu0 %v411_v0  ;;  %v414_v4 = vld [vmem:[%s602_s1 + $0x30] sm:$0xff]   ;;  %v416_v6 = vld [vmem:[%s602_s1 + $0x28] sm:$0xff]  }
   0x3   :  { %335 = vmatpush3.bf16.msra.mxu0 %v412_v1  ;;  %v417_v7 = vld [vmem:[%s602_s1 + $0x60] sm:$0xff]   ;;  %v419_v9 = vld [vmem:[%s602_s1 + $0x58] sm:$0xff]   ;;  %v421_v11 = vld [vmem:[%s602_s1 + $0x50] sm:$0xff]  }
   0x4   :  { %336 = vmatprep.subr.bf16.mxu0 %v413_v3  ;;  %v418_v8 = vld [vmem:[%s602_s1 + $0x20] sm:$0xff]   ;;  %v420_v10 = vld [vmem:[%s602_s1 + $0x18] sm:$0xff]   ;;  %v221_v15 = vld [vmem:[%s603_s2 + $0x70] sm:$0xff] }
   0x5   :  { %v25_v12 = vld [vmem:[%s601_s0] sm:$0xff]  ;;  %v222_v13 = vld [vmem:[%s603_s2 + $0x78] sm:$0xff]  ;;  %v422_v16 = vld [vmem:[%s602_s1 + $0x10] sm:$0xff]  }
   0x6   :  { %v316_v14 = vcombine.high %v25_v12, %v25_v12  ;;  %374 = vmatpush3.msra.mxu1 %v222_v13  ;;  %v220_v17 = vld [vmem:[%s603_s2 + $0x68] sm:$0xff] }
   0x7   :  { %337 = vmatpush3.bf16.msra.mxu0 %v414_v4  ;;  %375 = vmatprep.subr.mxu1 %v451_v2  ;;  %v423_v18 = vld [vmem:[%s602_s1 + $0x48] sm:$0xff]  }
   0x8   :  { %338 = vmatprep.subr.bf16.mxu0 %v415_v5  ;;  %193 = vmatprep.mubr.bf16.mxu0 %v316_v14 }
   0x9   :  { %376 = vmatpush3.msra.mxu1 %v221_v15 }
   0xb   :  { %339 = vmatpush3.bf16.msra.mxu0 %v416_v6 }
   0xc   :  { %340 = vmatprep.subr.bf16.mxu0 %v417_v7 }
   0xf   :  { %341 = vmatpush3.bf16.msra.mxu0 %v418_v8 }
  0x10   :  { %342 = vmatprep.subr.bf16.mxu0 %v419_v9 }
  0x13   :  { %343 = vmatpush3.bf16.msra.mxu0 %v420_v10 }
  0x14   :  { %344 = vmatprep.subr.bf16.mxu0 %v421_v11 }
  0x15   :  { %9 = vsyncpa [#allocation4], 0  ;;  %377 = vmatprep.subr.mxu1 %v451_v2  ;;  %v219_v19 = vld [vmem:[%s603_s2 + $0x60] sm:$0xff]  ;;  %v424_v20 = vld [vmem:[%s602_s1 + $0x8] sm:$0xff]   ;;  %v315_v27 = vcombine.low %v25_v12, %v25_v12  ;;  %vm452_vm0 = vmmov 0   ;;  %s453_s28 = smov [#allocation3]  }
  0x16   :  { %378 = vmatpush3.msra.mxu1 %v220_v17  ;;  %v218_v21 = vld [vmem:[%s603_s2 + $0x58] sm:$0xff]  ;;  %v425_v22 = vld [vmem:[%s602_s1 + $0x40] sm:$0xff]   ;;  %v217_v23 = vld [vmem:[%s603_s2 + $0x50] sm:$0xff]  ;;  %405 = vmatprep.mubr.msk.f32.mxu1 %vm452_vm0, %v451_v2  ;;  %s307_s29 = sshll.u32 %s453_s28, 4  ;;  %s308_s29 = int_to_ptr.vmem [resolvable:$true] %s307_s29 }
  0x17   :  { %345 = vmatpush3.bf16.msra.mxu0 %v422_v16  ;;  %379 = vmatprep.subr.mxu1 %v451_v2  ;;  %v426_v24 = vld [vmem:[%s602_s1] sm:$0xff]   ;;  %v216_v25 = vld [vmem:[%s603_s2 + $0x48] sm:$0xff]  ;;  %v214_v28 = vld [vmem:[%s603_s2 + $0x38] sm:$0xff]  ;;  %p434_p1 = scmp.lt.s32.totalorder %s308_s29, %s308_s29 }
  0x18   :  { %346 = vmatprep.subr.bf16.mxu0 %v423_v18  ;;  %380 = vmatpush3.msra.mxu1 %v219_v19  ;;  %v215_v26 = vld [vmem:[%s603_s2 + $0x40] sm:$0xff]  ;;  %v213_v29 = vld [vmem:[%s603_s2 + $0x30] sm:$0xff]  ;;  %v212_v30 = vld [vmem:[%s603_s2 + $0x28] sm:$0xff] }
  0x19   :  { %381 = vmatprep.subr.mxu1 %v451_v2  ;;  %v211_v31 = vld [vmem:[%s603_s2 + $0x20] sm:$0xff]  ;;  %v210_v32 = vld [vmem:[%s603_s2 + $0x18] sm:$0xff]  ;;  %v209_v33 = vld [vmem:[%s603_s2 + $0x10] sm:$0xff] }
  0x1a   :  { %382 = vmatpush3.msra.mxu1 %v218_v21  ;;  %v208_v34 = vld [vmem:[%s603_s2 + $0x8] sm:$0xff]  ;;  %v207_v35 = vld [vmem:[%s603_s2] sm:$0xff]  ;;  %s429_s2 = scalar_lea.vmem %s308_s29, 128 }
  0x1b   :  { %347 = vmatpush3.bf16.msra.mxu0 %v424_v20  ;;  %383 = vmatprep.subr.mxu1 %v451_v2  ;;  %v333_v41 = vld [vmem:[%s604_s3] ss:$0 sm:$0xff]  ;;  %p430_p0 = scmp.ne.s32.totalorder %s308_s29, %s429_s2  ;;  %p435_p2 = scmp.lt.s32.totalorder %s429_s2, %s429_s2 }
  0x1c   :  { %348 = vmatprep.subr.bf16.mxu0 %v425_v22  ;;  %384 = vmatpush3.msra.mxu1 %v217_v23 }
  0x1d   :  { %385 = vmatprep.subr.mxu1 %v451_v2  ;;  %p436_p3 = por %p435_p2, %p434_p1 }
  0x1e   :  { %386 = vmatpush3.msra.mxu1 %v216_v25 }
  0x1f   :  { %349 = vmatpush3.bf16.msra.mxu0 %v426_v24  ;;  %387 = vmatprep.subr.mxu1 %v451_v2  ;;  %p437_p4 = pnand %p436_p3, %p430_p0 }
  0x20   :  { %388 = vmatpush3.msra.mxu1 %v215_v26 }
  0x21   :  { %389 = vmatprep.subr.mxu1 %v451_v2 }
  0x22   :  { %194 = vmatmul.mubr.bf16.vlgmr.msra.gmra.mxu0 %v315_v27  ;;  %390 = vmatpush3.msra.mxu1 %v214_v28 }
  0x23   :  { %391 = vmatprep.subr.mxu1 %v451_v2 }
  0x24   :  { %392 = vmatpush3.msra.mxu1 %v213_v29 }
  0x25   :  { %393 = vmatprep.subr.mxu1 %v451_v2 }
  0x26   :  { %394 = vmatpush3.msra.mxu1 %v212_v30 }
  0x27   :  { %395 = vmatprep.subr.mxu1 %v451_v2 }
  0x28   :  { %396 = vmatpush3.msra.mxu1 %v211_v31 }
  0x29   :  { %397 = vmatprep.subr.mxu1 %v451_v2 }
  0x2a   :  { %398 = vmatpush3.msra.mxu1 %v210_v32 }
  0x2b   :  { %399 = vmatprep.subr.mxu1 %v451_v2 }
  0x2c   :  { %400 = vmatpush3.msra.mxu1 %v209_v33 }
  0x2d   :  { %401 = vmatprep.subr.mxu1 %v451_v2 }
  0x2e   :  { %402 = vmatpush3.msra.mxu1 %v208_v34 }
  0x2f   :  { %403 = vmatprep.subr.mxu1 %v451_v2 }
  0x30   :  { %404 = vmatpush3.msra.mxu1 %v207_v35 }
  0xe2   :  { %v350_v36 = vpop.f32.mrf.mxu0 }
  0xe4   :  { %v351_v37 = vpop.f32.mrf.mxu0 }
  0xe5   :  { %v352_v38 = vadd.f32 %v351_v37, %v350_v36 }
  0xe6   :  { %v353_v39 = vpop.f32.mrf.mxu0 }
  0xe7   :  { %406 = vmatmul.mubr.f32.vlgmr.msra.gmra.mxu1 %v352_v38 }
  0xe8   :  { %v354_v40 = vpop.f32.mrf.mxu0 }
 0x1a7   :  { %v296_v42 = vpop.f32.mrf.mxu1 }
 0x1a8   :  { %v297_v43 = vadd.f32 %v333_v41, %v296_v42 }
 0x1a9   :  { %v407_v44 = vpop.f32.mrf.mxu1 }
 0x1aa   :  { %300 = vst [vmem:[#allocation3] sm:$0xff] %v297_v43 }
 0x1ab   :  { %440 = shalt.err (!%p437_p4)
}
 0x1ac   :  { %310 = dma.vmem_to_hbm [thread:$0]  %s308_s29, 128, %s605_s4, [#allocation4]  }
 0x1ad   :  { %449 = dma.done.wait [#allocation4], 128  }
 0x1ae   :  { %450 = vsyncadd [#allocation4], 4294967168 }
 0x1af   :  { %314 = vsyncpa [#allocation4], 1 }

// kernel: gcn_forward.7
= control target key start
LH: loop header
LB: loop body
LE: loop exit
PB: predicated region body
PF: predicated region fallthrough
CT: control target
= control target key end

     0   :  { %s959_s1 = inlined_call_operand.vmem [shape: bf16[128,128], index: 1, kind: input, shape index: {}]   ;;  %s960_s0 = inlined_call_operand.vmem [shape: bf16[256,128], index: 0, kind: input, shape index: {}]   ;;  %s961_s2 = inlined_call_operand.vmem [shape: bf16[256,128], index: 2, kind: output, shape index: {}]  }
   0x1   :  { %v800_v0 = vld [vmem:[%s959_s1 + $0x38] sm:$0xff]   ;;  %v801_v1 = vld [vmem:[%s959_s1 + $0x30] sm:$0xff]   ;;  %v802_v2 = vld [vmem:[%s959_s1 + $0x28] sm:$0xff]  }
   0x2   :  { %736 = vmatprep.subr.bf16.mxu0 %v800_v0  ;;  %784 = vmatprep.subr.bf16.mxu1 %v800_v0  ;;  %v803_v3 = vld [vmem:[%s959_s1 + $0x20] sm:$0xff]   ;;  %v804_v6 = vld [vmem:[%s959_s1 + $0x18] sm:$0xff]   ;;  %v805_v7 = vld [vmem:[%s959_s1 + $0x10] sm:$0xff]  }
   0x3   :  { %737 = vmatpush3.bf16.msra.mxu0 %v800_v0  ;;  %792 = vmatpush3.bf16.msra.mxu1 %v800_v0  ;;  %v808_v4 = vld [vmem:[%s960_s0] sm:$0xff]   ;;  %v806_v8 = vld [vmem:[%s959_s1 + $0x8] sm:$0xff]   ;;  %v812_v12 = vld [vmem:[%s960_s0 + $0x10] sm:$0xff]  }
   0x4   :  { %738 = vmatprep.subr.bf16.mxu0 %v801_v1  ;;  %785 = vmatprep.subr.bf16.mxu1 %v801_v1  ;;  %v809_v5 = vld [vmem:[%s960_s0 + $0x40] sm:$0xff]   ;;  %v810_v10 = vld [vmem:[%s960_s0 + $0x8] sm:$0xff]   ;;  %v813_v13 = vld [vmem:[%s960_s0 + $0x50] sm:$0xff]  }
   0x5   :  { %752 = vmatprep.mubr.bf16.mxu0 %v808_v4  ;;  %768 = vmatprep.mubr.bf16.mxu1 %v809_v5  ;;  %v807_v9 = vld [vmem:[%s959_s1] sm:$0xff]   ;;  %v811_v11 = vld [vmem:[%s960_s0 + $0x48] sm:$0xff]   ;;  %v814_v14 = vld [vmem:[%s960_s0 + $0x18] sm:$0xff]  }
   0x6   :  { %v815_v15 = vld [vmem:[%s960_s0 + $0x58] sm:$0xff]   ;;  %v816_v16 = vld [vmem:[%s960_s0 + $0x20] sm:$0xff]   ;;  %v818_v18 = vld [vmem:[%s960_s0 + $0x28] sm:$0xff]  }
   0x7   :  { %739 = vmatpush3.bf16.msra.mxu0 %v801_v1  ;;  %793 = vmatpush3.bf16.msra.mxu1 %v801_v1  ;;  %v817_v17 = vld [vmem:[%s960_s0 + $0x60] sm:$0xff]   ;;  %v819_v19 = vld [vmem:[%s960_s0 + $0x68] sm:$0xff]   ;;  %v820_v20 = vld [vmem:[%s960_s0 + $0x30] sm:$0xff]  }
   0x8   :  { %740 = vmatprep.subr.bf16.mxu0 %v802_v2  ;;  %786 = vmatprep.subr.bf16.mxu1 %v802_v2  ;;  %v821_v21 = vld [vmem:[%s960_s0 + $0x70] sm:$0xff]   ;;  %v822_v22 = vld [vmem:[%s960_s0 + $0x38] sm:$0xff]  }
   0x9   :  { %v823_v23 = vld [vmem:[%s960_s0 + $0x78] sm:$0xff]  }
   0xb   :  { %741 = vmatpush3.bf16.msra.mxu0 %v802_v2  ;;  %794 = vmatpush3.bf16.msra.mxu1 %v802_v2 }
   0xc   :  { %742 = vmatprep.subr.bf16.mxu0 %v803_v3  ;;  %787 = vmatprep.subr.bf16.mxu1 %v803_v3 }
   0xf   :  { %743 = vmatpush3.bf16.msra.mxu0 %v803_v3  ;;  %795 = vmatpush3.bf16.msra.mxu1 %v803_v3 }
  0x10   :  { %744 = vmatprep.subr.bf16.mxu0 %v804_v6  ;;  %788 = vmatprep.subr.bf16.mxu1 %v804_v6 }
  0x13   :  { %745 = vmatpush3.bf16.msra.mxu0 %v804_v6  ;;  %796 = vmatpush3.bf16.msra.mxu1 %v804_v6 }
  0x14   :  { %746 = vmatprep.subr.bf16.mxu0 %v805_v7  ;;  %789 = vmatprep.subr.bf16.mxu1 %v805_v7 }
  0x17   :  { %747 = vmatpush3.bf16.msra.mxu0 %v805_v7  ;;  %797 = vmatpush3.bf16.msra.mxu1 %v805_v7 }
  0x18   :  { %748 = vmatprep.subr.bf16.mxu0 %v806_v8  ;;  %790 = vmatprep.subr.bf16.mxu1 %v806_v8 }
  0x1b   :  { %749 = vmatpush3.bf16.msra.mxu0 %v806_v8  ;;  %798 = vmatpush3.bf16.msra.mxu1 %v806_v8 }
  0x1c   :  { %750 = vmatprep.subr.bf16.mxu0 %v807_v9  ;;  %791 = vmatprep.subr.bf16.mxu1 %v807_v9 }
  0x1f   :  { %751 = vmatpush3.bf16.msra.mxu0 %v807_v9  ;;  %799 = vmatpush3.bf16.msra.mxu1 %v807_v9 }
  0x22   :  { %753 = vmatmul.mubr.bf16.vlgmr.msra.gmra.mxu0 %v810_v10  ;;  %769 = vmatmul.mubr.bf16.vlgmr.msra.gmra.mxu1 %v811_v11 }
  0x23   :  { %756 = vmatprep.mubr.bf16.mxu0 %v812_v12  ;;  %772 = vmatprep.mubr.bf16.mxu1 %v813_v13 }
  0x2a   :  { %757 = vmatmul.mubr.bf16.gmra.mxu0 %v814_v14  ;;  %773 = vmatmul.mubr.bf16.gmra.mxu1 %v815_v15 }
  0x2b   :  { %760 = vmatprep.mubr.bf16.mxu0 %v816_v16  ;;  %776 = vmatprep.mubr.bf16.mxu1 %v817_v17 }
  0x32   :  { %761 = vmatmul.mubr.bf16.gmra.mxu0 %v818_v18  ;;  %777 = vmatmul.mubr.bf16.gmra.mxu1 %v819_v19 }
  0x33   :  { %764 = vmatprep.mubr.bf16.mxu0 %v820_v20  ;;  %780 = vmatprep.mubr.bf16.mxu1 %v821_v21 }
  0x3a   :  { %765 = vmatmul.mubr.bf16.gmra.mxu0 %v822_v22  ;;  %781 = vmatmul.mubr.bf16.gmra.mxu1 %v823_v23 }
  0xe2   :  { %v754_v24 = vpop.f32.mrf.mxu0  ;;  %v770_v25 = vpop.f32.mrf.mxu1 }
  0xe4   :  { %v238_v26 = vpop.f32.mrf.mxu0  ;;  %v302_v27 = vpop.f32.mrf.mxu1 }
  0xe6   :  { %v755_v28 = vpop.f32.mrf.mxu0  ;;  %v771_v29 = vpop.f32.mrf.mxu1 }
  0xe7   :  { %v625_v30 = vpack.c.bf16 %v755_v28, %v754_v24  ;;  %v665_v31 = vpack.c.bf16 %v771_v29, %v770_v25 }
  0xe8   :  { %v241_v32 = vpop.f32.mrf.mxu0  ;;  %v305_v33 = vpop.f32.mrf.mxu1 }
  0xe9   :  { %697 = vst [vmem:[%s961_s2 + $0x8] sm:$0xff] %v625_v30   ;;  %705 = vst [vmem:[%s961_s2 + $0x48] sm:$0xff] %v665_v31   ;;  %v620_v34 = vpack.c.bf16 %v241_v32, %v238_v26  ;;  %v660_v35 = vpack.c.bf16 %v305_v33, %v302_v27 }
  0xea   :  { %v758_v36 = vpop.f32.mrf.mxu0  ;;  %v774_v37 = vpop.f32.mrf.mxu1 }
  0xeb   :  { %621 = vst [vmem:[%s961_s2] sm:$0xff] %v620_v34   ;;  %704 = vst [vmem:[%s961_s2 + $0x40] sm:$0xff] %v660_v35  }
  0xec   :  { %v254_v38 = vpop.f32.mrf.mxu0  ;;  %v318_v39 = vpop.f32.mrf.mxu1 }
  0xee   :  { %v759_v40 = vpop.f32.mrf.mxu0  ;;  %v775_v41 = vpop.f32.mrf.mxu1 }
  0xef   :  { %v635_v42 = vpack.c.bf16 %v759_v40, %v758_v36  ;;  %v675_v43 = vpack.c.bf16 %v775_v41, %v774_v37 }
  0xf0   :  { %v257_v44 = vpop.f32.mrf.mxu0  ;;  %v321_v45 = vpop.f32.mrf.mxu1 }
  0xf1   :  { %699 = vst [vmem:[%s961_s2 + $0x18] sm:$0xff] %v635_v42   ;;  %707 = vst [vmem:[%s961_s2 + $0x58] sm:$0xff] %v675_v43   ;;  %v630_v46 = vpack.c.bf16 %v257_v44, %v254_v38  ;;  %v670_v47 = vpack.c.bf16 %v321_v45, %v318_v39 }
  0xf2   :  { %v762_v48 = vpop.f32.mrf.mxu0  ;;  %v778_v49 = vpop.f32.mrf.mxu1 }
  0xf3   :  { %698 = vst [vmem:[%s961_s2 + $0x10] sm:$0xff] %v630_v46   ;;  %706 = vst [vmem:[%s961_s2 + $0x50] sm:$0xff] %v670_v47  }
  0xf4   :  { %v270_v50 = vpop.f32.mrf.mxu0  ;;  %v334_v51 = vpop.f32.mrf.mxu1 }
  0xf6   :  { %v763_v52 = vpop.f32.mrf.mxu0  ;;  %v779_v53 = vpop.f32.mrf.mxu1 }
  0xf7   :  { %v645_v54 = vpack.c.bf16 %v763_v52, %v762_v48  ;;  %v685_v55 = vpack.c.bf16 %v779_v53, %v778_v49 }
  0xf8   :  { %v273_v56 = vpop.f32.mrf.mxu0  ;;  %v337_v57 = vpop.f32.mrf.mxu1 }
  0xf9   :  { %701 = vst [vmem:[%s961_s2 + $0x28] sm:$0xff] %v645_v54   ;;  %709 = vst [vmem:[%s961_s2 + $0x68] sm:$0xff] %v685_v55   ;;  %v640_v58 = vpack.c.bf16 %v273_v56, %v270_v50  ;;  %v680_v59 = vpack.c.bf16 %v337_v57, %v334_v51 }
  0xfa   :  { %v766_v60 = vpop.f32.mrf.mxu0  ;;  %v782_v61 = vpop.f32.mrf.mxu1 }
  0xfb   :  { %700 = vst [vmem:[%s961_s2 + $0x20] sm:$0xff] %v640_v58   ;;  %708 = vst [vmem:[%s961_s2 + $0x60] sm:$0xff] %v680_v59  }
  0xfc   :  { %v286_v62 = vpop.f32.mrf.mxu0  ;;  %v350_v63 = vpop.f32.mrf.mxu1 }
  0xfe   :  { %v767_v0 = vpop.f32.mrf.mxu0  ;;  %v783_v1 = vpop.f32.mrf.mxu1 }
  0xff   :  { %v655_v2 = vpack.c.bf16 %v767_v0, %v766_v60  ;;  %v695_v3 = vpack.c.bf16 %v783_v1, %v782_v61 }
 0x100   :  { %v289_v4 = vpop.f32.mrf.mxu0  ;;  %v353_v5 = vpop.f32.mrf.mxu1 }
 0x101   :  { %703 = vst [vmem:[%s961_s2 + $0x38] sm:$0xff] %v655_v2   ;;  %711 = vst [vmem:[%s961_s2 + $0x78] sm:$0xff] %v695_v3   ;;  %v650_v6 = vpack.c.bf16 %v289_v4, %v286_v62  ;;  %v690_v7 = vpack.c.bf16 %v353_v5, %v350_v63 }
 0x103   :  { %702 = vst [vmem:[%s961_s2 + $0x30] sm:$0xff] %v650_v6   ;;  %710 = vst [vmem:[%s961_s2 + $0x70] sm:$0xff] %v690_v7  }

// kernel: gcn_forward.12
= control target key start
LH: loop header
LB: loop body
LE: loop exit
PB: predicated region body
PF: predicated region fallthrough
CT: control target
= control target key end

     0   :  { %v1324_v0 = vmov 0.0   ;;  %s1515_s0 = inlined_call_operand.<no memory space> [shape: s32[1], index: 0, kind: input, shape index: {}]   ;;  %s1516_s1 = inlined_call_operand.<no memory space> [shape: s32[1], index: 1, kind: input, shape index: {}]   ;;  %s1517_s3 = inlined_call_operand.vmem [shape: bf16[256,128], index: 3, kind: input, shape index: {}]   ;;  %s1518_s4 = inlined_call_operand.vmem [shape: f32[1,128], index: 4, kind: input, shape index: {}]   ;;  %s1519_s5 = inlined_call_operand.vmem [shape: bf16[256,128], index: 5, kind: output, shape index: {}]   ;;  %s1520_s2 = inlined_call_operand.vmem [shape: bf16[256,256], index: 2, kind: input, shape index: {}]  }
   0x1   :  { %10 = sst [smem:[#allocation4]] %s1515_s0  ;;  %s917_s22 = sshll.u32 %s1515_s0, 1  ;;  %50 = vst [vmem:[#allocation2 + $0xb0] sm:$0xff] %v1324_v0  ;;  %51 = vst [vmem:[#allocation2] sm:$0xff] %v1324_v0 }
   0x2   :  { %52 = vst [vmem:[#allocation2 + $0xd8] sm:$0xff] %v1324_v0  ;;  %53 = vst [vmem:[#allocation2 + $0x18] sm:$0xff] %v1324_v0  ;;  %p38_p0 = scmp.lt.s32.totalorder %s917_s22, 1  ;;  %p920_p1 = scmp.le.s32.totalorder %s1516_s1, 0 }
   0x3   :  { %54 = vst [vmem:[#allocation2 + $0x50] sm:$0xff] %v1324_v0  ;;  %55 = vst [vmem:[#allocation2 + $0x68] sm:$0xff] %v1324_v0  ;;  %s88_s8 = sld [smem:[#allocation4]] (!%p920_p1) }
   0x4   :  { %56 = vst [vmem:[#allocation2 + $0x30] sm:$0xff] %v1324_v0  ;;  %57 = vst [vmem:[#allocation2 + $0x48] sm:$0xff] %v1324_v0  ;;  %s1522_s22 = smov (!%p38_p0, %s917_s22), 1 }
   0x5   :  { %58 = vst [vmem:[#allocation2 + $0x80] sm:$0xff] %v1324_v0  ;;  %59 = vst [vmem:[#allocation2 + $0x88] sm:$0xff] %v1324_v0  ;;  %s918_s27 = sshll.u32 %s1522_s22, 2 }
   0x6   :  { %60 = vst [vmem:[#allocation2 + $0xe8] sm:$0xff] %v1324_v0  ;;  %61 = vst [vmem:[#allocation2 + $0xb8] sm:$0xff] %v1324_v0  ;;  %s1372_s30 = scalar_lea.vmem %s1520_s2, %s918_s27 }
   0x7   :  { %62 = vst [vmem:[#allocation2 + $0x60] sm:$0xff] %v1324_v0  ;;  %63 = vst [vmem:[#allocation2 + $0xf0] sm:$0xff] %v1324_v0 }
   0x8   :  { %64 = vst [vmem:[#allocation2 + $0x8] sm:$0xff] %v1324_v0  ;;  %65 = vst [vmem:[#allocation2 + $0x78] sm:$0xff] %v1324_v0 }
   0x9   :  { %66 = vst [vmem:[#allocation2 + $0x38] sm:$0xff] %v1324_v0  ;;  %67 = vst [vmem:[#allocation2 + $0x58] sm:$0xff] %v1324_v0  ;;  %s921_s0 = sshll.u32 (!%p920_p1), %s88_s8, 8 }
   0xa   :  { %68 = vst [vmem:[#allocation2 + $0x40] sm:$0xff] %v1324_v0  ;;  %69 = vst [vmem:[#allocation2 + $0xc8] sm:$0xff] %v1324_v0  ;;  %s90_s9 = sshra.s32 (!%p920_p1), %s921_s0, 3 }
   0xb   :  { %70 = vst [vmem:[#allocation2 + $0xe0] sm:$0xff] %v1324_v0  ;;  %71 = vst [vmem:[#allocation2 + $0x90] sm:$0xff] %v1324_v0  ;;  %s922_s10 = sshll.u32 (!%p920_p1), %s90_s9, 2 }
   0xc   :  { %72 = vst [vmem:[#allocation2 + $0x70] sm:$0xff] %v1324_v0  ;;  %73 = vst [vmem:[#allocation2 + $0xc0] sm:$0xff] %v1324_v0  ;;  %86 = sbr.rel (%p920_p1) target bundleno = 311 (0x137), region = 21  ;;  %s1382_s2 = scalar_lea.vmem (!%p920_p1), %s1517_s3, %s922_s10 }
   0xd   :  { %74 = vst [vmem:[#allocation2 + $0xa8] sm:$0xff] %v1324_v0  ;;  %75 = vst [vmem:[#allocation2 + $0xd0] sm:$0xff] %v1324_v0 }
   0xe   :  { %76 = vst [vmem:[#allocation2 + $0x10] sm:$0xff] %v1324_v0  ;;  %77 = vst [vmem:[#allocation2 + $0x28] sm:$0xff] %v1324_v0 }
   0xf   :  { %78 = vst [vmem:[#allocation2 + $0xa0] sm:$0xff] %v1324_v0  ;;  %79 = vst [vmem:[#allocation2 + $0xf8] sm:$0xff] %v1324_v0 }
  0x10   :  { %80 = vst [vmem:[#allocation2 + $0x20] sm:$0xff] %v1324_v0  ;;  %81 = vst [vmem:[#allocation2 + $0x98] sm:$0xff] %v1324_v0 }
  0x11   :  { %v1278_v1 = vld [vmem:[%s1372_s30 + $0x4] ss:$8 sps:$4 sm:$0xff]   ;;  %v1260_v3 = vld [vmem:[%s1382_s2 + $0x78] sm:$0xff]   ;;  %v1262_v5 = vld [vmem:[%s1382_s2 + $0x70] sm:$0xff]  }
  0x12   :  { %v1281_v2 = vld [vmem:[%s1372_s30 + $0x84] ss:$8 sps:$4 sm:$0xff]   ;;  %478 = vmatprep.mubr.bf16.mxu0 %v1278_v1  ;;  %v1261_v4 = vld [vmem:[%s1382_s2 + $0x38] sm:$0xff]   ;;  %1131 = vmatprep.subr.bf16.mxu0 %v1260_v3  ;;  %v1263_v6 = vld [vmem:[%s1382_s2 + $0x30] sm:$0xff]  }
  0x13   :  { %542 = vmatprep.mubr.bf16.mxu1 %v1281_v2  ;;  %1243 = vmatprep.subr.bf16.mxu1 %v1260_v3  ;;  %v1264_v7 = vld [vmem:[%s1382_s2 + $0x68] sm:$0xff]   ;;  %v1266_v9 = vld [vmem:[%s1382_s2 + $0x60] sm:$0xff]   ;;  %v1268_v11 = vld [vmem:[%s1382_s2 + $0x58] sm:$0xff]  }
  0x14   :  { %1132 = vmatpush3.bf16.msra.mxu0 %v1261_v4  ;;  %1251 = vmatpush3.bf16.msra.mxu1 %v1261_v4  ;;  %v1265_v8 = vld [vmem:[%s1382_s2 + $0x28] sm:$0xff]   ;;  %v1267_v10 = vld [vmem:[%s1382_s2 + $0x20] sm:$0xff]   ;;  %v1269_v12 = vld [vmem:[%s1382_s2 + $0x18] sm:$0xff]  }
  0x15   :  { %1133 = vmatprep.subr.bf16.mxu0 %v1262_v5  ;;  %1244 = vmatprep.subr.bf16.mxu1 %v1262_v5  ;;  %v1270_v13 = vld [vmem:[%s1382_s2 + $0x50] sm:$0xff]   ;;  %v1272_v15 = vld [vmem:[%s1382_s2 + $0x48] sm:$0xff]   ;;  %v1274_v17 = vld [vmem:[%s1382_s2 + $0x40] sm:$0xff]  }
  0x16   :  { %v1271_v14 = vld [vmem:[%s1382_s2 + $0x10] sm:$0xff]   ;;  %v1273_v16 = vld [vmem:[%s1382_s2 + $0x8] sm:$0xff]   ;;  %v1275_v18 = vld [vmem:[%s1382_s2] sm:$0xff]  }
  0x17   :  { %v1276_v19 = vld [vmem:[%s1372_s30] ss:$8 sps:$4 sm:$0xff]   ;;  %v1282_v21 = vld [vmem:[%s1372_s30 + $0x14] ss:$8 sps:$4 sm:$0xff]   ;;  %v1286_v23 = vld [vmem:[%s1372_s30 + $0x10] ss:$8 sps:$4 sm:$0xff]  }
  0x18   :  { %1134 = vmatpush3.bf16.msra.mxu0 %v1263_v6  ;;  %1252 = vmatpush3.bf16.msra.mxu1 %v1263_v6  ;;  %v1279_v20 = vld [vmem:[%s1372_s30 + $0x80] ss:$8 sps:$4 sm:$0xff]   ;;  %v1284_v22 = vld [vmem:[%s1372_s30 + $0x94] ss:$8 sps:$4 sm:$0xff]   ;;  %v1287_v24 = vld [vmem:[%s1372_s30 + $0x90] ss:$8 sps:$4 sm:$0xff]  }
  0x19   :  { %1135 = vmatprep.subr.bf16.mxu0 %v1264_v7  ;;  %1245 = vmatprep.subr.bf16.mxu1 %v1264_v7  ;;  %v1288_v25 = vld [vmem:[%s1372_s30 + $0x24] ss:$8 sps:$4 sm:$0xff]   ;;  %v1292_v27 = vld [vmem:[%s1372_s30 + $0x20] ss:$8 sps:$4 sm:$0xff]   ;;  %v1294_v29 = vld [vmem:[%s1372_s30 + $0x34] ss:$8 sps:$4 sm:$0xff]  }
  0x1a   :  { %v1290_v26 = vld [vmem:[%s1372_s30 + $0xa4] ss:$8 sps:$4 sm:$0xff]   ;;  %v1293_v28 = vld [vmem:[%s1372_s30 + $0xa0] ss:$8 sps:$4 sm:$0xff]   ;;  %v1296_v30 = vld [vmem:[%s1372_s30 + $0xb4] ss:$8 sps:$4 sm:$0xff]  }
  0x1b   :  { %v1298_v31 = vld [vmem:[%s1372_s30 + $0x30] ss:$8 sps:$4 sm:$0xff]   ;;  %v1300_v33 = vld [vmem:[%s1372_s30 + $0x44] ss:$8 sps:$4 sm:$0xff]   ;;  %v1304_v35 = vld [vmem:[%s1372_s30 + $0x40] ss:$8 sps:$4 sm:$0xff]  }
  0x1c   :  { %1136 = vmatpush3.bf16.msra.mxu0 %v1265_v8  ;;  %1253 = vmatpush3.bf16.msra.mxu1 %v1265_v8  ;;  %v1299_v32 = vld [vmem:[%s1372_s30 + $0xb0] ss:$8 sps:$4 sm:$0xff]   ;;  %v1302_v34 = vld [vmem:[%s1372_s30 + $0xc4] ss:$8 sps:$4 sm:$0xff]   ;;  %v1305_v36 = vld [vmem:[%s1372_s30 + $0xc0] ss:$8 sps:$4 sm:$0xff]  }
  0x1d   :  { %1137 = vmatprep.subr.bf16.mxu0 %v1266_v9  ;;  %1246 = vmatprep.subr.bf16.mxu1 %v1266_v9  ;;  %v1306_v37 = vld [vmem:[%s1372_s30 + $0x54] ss:$8 sps:$4 sm:$0xff]   ;;  %v1310_v39 = vld [vmem:[%s1372_s30 + $0x50] ss:$8 sps:$4 sm:$0xff]   ;;  %v1312_v41 = vld [vmem:[%s1372_s30 + $0x64] ss:$8 sps:$4 sm:$0xff]  }
  0x1e   :  { %v1308_v38 = vld [vmem:[%s1372_s30 + $0xd4] ss:$8 sps:$4 sm:$0xff]   ;;  %v1311_v40 = vld [vmem:[%s1372_s30 + $0xd0] ss:$8 sps:$4 sm:$0xff]   ;;  %v1314_v42 = vld [vmem:[%s1372_s30 + $0xe4] ss:$8 sps:$4 sm:$0xff]  }
  0x1f   :  { %v1316_v43 = vld [vmem:[%s1372_s30 + $0x60] ss:$8 sps:$4 sm:$0xff]   ;;  %v1318_v45 = vld [vmem:[%s1372_s30 + $0x74] ss:$8 sps:$4 sm:$0xff]   ;;  %v1322_v47 = vld [vmem:[%s1372_s30 + $0x70] ss:$8 sps:$4 sm:$0xff]  }
  0x20   :  { %1138 = vmatpush3.bf16.msra.mxu0 %v1267_v10  ;;  %1254 = vmatpush3.bf16.msra.mxu1 %v1267_v10  ;;  %v1317_v44 = vld [vmem:[%s1372_s30 + $0xe0] ss:$8 sps:$4 sm:$0xff]   ;;  %v1320_v46 = vld [vmem:[%s1372_s30 + $0xf4] ss:$8 sps:$4 sm:$0xff]   ;;  %v1323_v48 = vld [vmem:[%s1372_s30 + $0xf0] ss:$8 sps:$4 sm:$0xff]  }
  0x21   :  { %1139 = vmatprep.subr.bf16.mxu0 %v1268_v11  ;;  %1247 = vmatprep.subr.bf16.mxu1 %v1268_v11  ;;  %v126_v51 = vld [vmem:[#allocation2 + $0xb0] sm:$0xff]  ;;  %v142_v53 = vld [vmem:[#allocation2 + $0x38] sm:$0xff]  ;;  %v127_v61 = vld [vmem:[#allocation2] sm:$0xff] }
  0x22   :  { %v143_v63 = vld [vmem:[#allocation2 + $0x58] sm:$0xff]  ;;  %v144_v9 = vld [vmem:[#allocation2 + $0x40] sm:$0xff] }
  0x23   :  { %v128_v7 = vld [vmem:[#allocation2 + $0xd8] sm:$0xff] }
  0x24   :  { %1140 = vmatpush3.bf16.msra.mxu0 %v1269_v12  ;;  %1255 = vmatpush3.bf16.msra.mxu1 %v1269_v12 }
  0x25   :  { %1141 = vmatprep.subr.bf16.mxu0 %v1270_v13  ;;  %1248 = vmatprep.subr.bf16.mxu1 %v1270_v13 }
  0x28   :  { %1142 = vmatpush3.bf16.msra.mxu0 %v1271_v14  ;;  %1256 = vmatpush3.bf16.msra.mxu1 %v1271_v14 }
  0x29   :  { %1143 = vmatprep.subr.bf16.mxu0 %v1272_v15  ;;  %1249 = vmatprep.subr.bf16.mxu1 %v1272_v15 }
  0x2c   :  { %1144 = vmatpush3.bf16.msra.mxu0 %v1273_v16  ;;  %1257 = vmatpush3.bf16.msra.mxu1 %v1273_v16 }
  0x2d   :  { %1145 = vmatprep.subr.bf16.mxu0 %v1274_v17  ;;  %1250 = vmatprep.subr.bf16.mxu1 %v1274_v17  ;;  %v129_v17 = vld [vmem:[#allocation2 + $0x18] sm:$0xff] }
  0x30   :  { %1146 = vmatpush3.bf16.msra.mxu0 %v1275_v18  ;;  %1258 = vmatpush3.bf16.msra.mxu1 %v1275_v18 }
  0x33   :  { %479 = vmatmul.mubr.bf16.vlgmr.msra.gmra.mxu0 %v1276_v19  ;;  %543 = vmatmul.mubr.bf16.vlgmr.msra.gmra.mxu1 %v1279_v20  ;;  %v145_v19 = vld [vmem:[#allocation2 + $0xc8] sm:$0xff] }
  0x34   :  { %486 = vmatprep.mubr.bf16.mxu0 %v1282_v21  ;;  %550 = vmatprep.mubr.bf16.mxu1 %v1284_v22 }
  0x3b   :  { %487 = vmatmul.mubr.bf16.gmra.mxu0 %v1286_v23  ;;  %551 = vmatmul.mubr.bf16.gmra.mxu1 %v1287_v24 }
  0x3c   :  { %494 = vmatprep.mubr.bf16.mxu0 %v1288_v25  ;;  %558 = vmatprep.mubr.bf16.mxu1 %v1290_v26 }
  0x43   :  { %495 = vmatmul.mubr.bf16.gmra.mxu0 %v1292_v27  ;;  %559 = vmatmul.mubr.bf16.gmra.mxu1 %v1293_v28  ;;  %v130_v27 = vld [vmem:[#allocation2 + $0x50] sm:$0xff] }
  0x44   :  { %502 = vmatprep.mubr.bf16.mxu0 %v1294_v29  ;;  %566 = vmatprep.mubr.bf16.mxu1 %v1296_v30  ;;  %v146_v29 = vld [vmem:[#allocation2 + $0xe0] sm:$0xff] }
  0x4b   :  { %503 = vmatmul.mubr.bf16.gmra.mxu0 %v1298_v31  ;;  %567 = vmatmul.mubr.bf16.gmra.mxu1 %v1299_v32 }
  0x4c   :  { %510 = vmatprep.mubr.bf16.mxu0 %v1300_v33  ;;  %574 = vmatprep.mubr.bf16.mxu1 %v1302_v34 }
  0x53   :  { %511 = vmatmul.mubr.bf16.gmra.mxu0 %v1304_v35  ;;  %575 = vmatmul.mubr.bf16.gmra.mxu1 %v1305_v36 }
  0x54   :  { %518 = vmatprep.mubr.bf16.mxu0 %v1306_v37  ;;  %582 = vmatprep.mubr.bf16.mxu1 %v1308_v38  ;;  %v131_v37 = vld [vmem:[#allocation2 + $0x68] sm:$0xff] }
  0x5b   :  { %519 = vmatmul.mubr.bf16.gmra.mxu0 %v1310_v39  ;;  %583 = vmatmul.mubr.bf16.gmra.mxu1 %v1311_v40  ;;  %v147_v39 = vld [vmem:[#allocation2 + $0x90] sm:$0xff] }
  0x5c   :  { %526 = vmatprep.mubr.bf16.mxu0 %v1312_v41  ;;  %590 = vmatprep.mubr.bf16.mxu1 %v1314_v42 }
  0x63   :  { %527 = vmatmul.mubr.bf16.gmra.mxu0 %v1316_v43  ;;  %591 = vmatmul.mubr.bf16.gmra.mxu1 %v1317_v44 }
  0x64   :  { %534 = vmatprep.mubr.bf16.mxu0 %v1318_v45  ;;  %598 = vmatprep.mubr.bf16.mxu1 %v1320_v46 }
  0x6b   :  { %535 = vmatmul.mubr.bf16.gmra.mxu0 %v1322_v47  ;;  %599 = vmatmul.mubr.bf16.gmra.mxu1 %v1323_v48  ;;  %v132_v47 = vld [vmem:[#allocation2 + $0x30] sm:$0xff] }
  0xf3   :  { %v1147_v49 = vpop.f32.mrf.mxu0  ;;  %v1195_v50 = vpop.f32.mrf.mxu1 }
  0xf5   :  { %v1148_v52 = vpop.f32.mrf.mxu0  ;;  %v1196_v54 = vpop.f32.mrf.mxu1 }
  0xf6   :  { %v1149_v55 = vadd.f32 %v1148_v52, %v1147_v49  ;;  %v1197_v56 = vadd.f32 %v1196_v54, %v1195_v50  ;;  %v148_v49 = vld [vmem:[#allocation2 + $0x70] sm:$0xff] }
  0xf7   :  { %v1150_v57 = vpop.f32.mrf.mxu0  ;;  %v1198_v58 = vpop.f32.mrf.mxu1 }
  0xf8   :  { %v607_v59 = vadd.f32 %v1149_v55, %v126_v51  ;;  %v623_v60 = vadd.f32 %v1197_v56, %v142_v53 }
  0xf9   :  { %v1151_v62 = vpop.f32.mrf.mxu0  ;;  %v1199_v0 = vpop.f32.mrf.mxu1 }
  0xfa   :  { %639 = vst [vmem:[#allocation2 + $0xb0] sm:$0xff] %v607_v59  ;;  %655 = vst [vmem:[#allocation2 + $0x38] sm:$0xff] %v623_v60  ;;  %v1152_v1 = vadd.f32 %v1151_v62, %v1150_v57  ;;  %v1200_v2 = vadd.f32 %v1199_v0, %v1198_v58  ;;  %v133_v57 = vld [vmem:[#allocation2 + $0x48] sm:$0xff]  ;;  %v149_v59 = vld [vmem:[#allocation2 + $0xc0] sm:$0xff] }
  0xfb   :  { %v1153_v3 = vpop.f32.mrf.mxu0  ;;  %v1201_v4 = vpop.f32.mrf.mxu1 }
  0xfc   :  { %v608_v5 = vadd.f32 %v1152_v1, %v127_v61  ;;  %v624_v6 = vadd.f32 %v1200_v2, %v143_v63 }
  0xfd   :  { %v1154_v8 = vpop.f32.mrf.mxu0  ;;  %v1202_v10 = vpop.f32.mrf.mxu1 }
  0xfe   :  { %640 = vst [vmem:[#allocation2] sm:$0xff] %v608_v5  ;;  %656 = vst [vmem:[#allocation2 + $0x58] sm:$0xff] %v624_v6  ;;  %v1155_v11 = vadd.f32 %v1154_v8, %v1153_v3  ;;  %v1203_v12 = vadd.f32 %v1202_v10, %v1201_v4  ;;  %v134_v3 = vld [vmem:[#allocation2 + $0x80] sm:$0xff]  ;;  %v150_v5 = vld [vmem:[#allocation2 + $0xa8] sm:$0xff] }
  0xff   :  { %v1156_v13 = vpop.f32.mrf.mxu0  ;;  %v1204_v14 = vpop.f32.mrf.mxu1 }
 0x100   :  { %v609_v15 = vadd.f32 %v1155_v11, %v128_v7  ;;  %v625_v16 = vadd.f32 %v1203_v12, %v144_v9 }
 0x101   :  { %v1157_v18 = vpop.f32.mrf.mxu0  ;;  %v1205_v20 = vpop.f32.mrf.mxu1 }
 0x102   :  { %641 = vst [vmem:[#allocation2 + $0xd8] sm:$0xff] %v609_v15  ;;  %657 = vst [vmem:[#allocation2 + $0x40] sm:$0xff] %v625_v16  ;;  %v1158_v21 = vadd.f32 %v1157_v18, %v1156_v13  ;;  %v1206_v22 = vadd.f32 %v1205_v20, %v1204_v14  ;;  %v135_v13 = vld [vmem:[#allocation2 + $0x88] sm:$0xff]  ;;  %v151_v15 = vld [vmem:[#allocation2 + $0xd0] sm:$0xff] }
 0x103   :  { %v1159_v23 = vpop.f32.mrf.mxu0  ;;  %v1207_v24 = vpop.f32.mrf.mxu1 }
 0x104   :  { %v610_v25 = vadd.f32 %v1158_v21, %v129_v17  ;;  %v626_v26 = vadd.f32 %v1206_v22, %v145_v19 }
 0x105   :  { %v1160_v28 = vpop.f32.mrf.mxu0  ;;  %v1208_v30 = vpop.f32.mrf.mxu1 }
 0x106   :  { %642 = vst [vmem:[#allocation2 + $0x18] sm:$0xff] %v610_v25  ;;  %658 = vst [vmem:[#allocation2 + $0xc8] sm:$0xff] %v626_v26  ;;  %v1161_v31 = vadd.f32 %v1160_v28, %v1159_v23  ;;  %v1209_v32 = vadd.f32 %v1208_v30, %v1207_v24  ;;  %v136_v23 = vld [vmem:[#allocation2 + $0xe8] sm:$0xff]  ;;  %v152_v25 = vld [vmem:[#allocation2 + $0x10] sm:$0xff] }
 0x107   :  { %v1162_v33 = vpop.f32.mrf.mxu0  ;;  %v1210_v34 = vpop.f32.mrf.mxu1 }
 0x108   :  { %v611_v35 = vadd.f32 %v1161_v31, %v130_v27  ;;  %v627_v36 = vadd.f32 %v1209_v32, %v146_v29 }
 0x109   :  { %v1163_v38 = vpop.f32.mrf.mxu0  ;;  %v1211_v40 = vpop.f32.mrf.mxu1 }
 0x10a   :  { %643 = vst [vmem:[#allocation2 + $0x50] sm:$0xff] %v611_v35  ;;  %659 = vst [vmem:[#allocation2 + $0xe0] sm:$0xff] %v627_v36  ;;  %v1164_v41 = vadd.f32 %v1163_v38, %v1162_v33  ;;  %v1212_v42 = vadd.f32 %v1211_v40, %v1210_v34  ;;  %v137_v33 = vld [vmem:[#allocation2 + $0xb8] sm:$0xff]  ;;  %v153_v35 = vld [vmem:[#allocation2 + $0x28] sm:$0xff] }
 0x10b   :  { %v1165_v43 = vpop.f32.mrf.mxu0  ;;  %v1213_v44 = vpop.f32.mrf.mxu1 }
 0x10c   :  { %v612_v45 = vadd.f32 %v1164_v41, %v131_v37  ;;  %v628_v46 = vadd.f32 %v1212_v42, %v147_v39 }
 0x10d   :  { %v1166_v48 = vpop.f32.mrf.mxu0  ;;  %v1214_v50 = vpop.f32.mrf.mxu1 }
 0x10e   :  { %644 = vst [vmem:[#allocation2 + $0x68] sm:$0xff] %v612_v45  ;;  %660 = vst [vmem:[#allocation2 + $0x90] sm:$0xff] %v628_v46  ;;  %v1167_v51 = vadd.f32 %v1166_v48, %v1165_v43  ;;  %v1215_v52 = vadd.f32 %v1214_v50, %v1213_v44  ;;  %v138_v43 = vld [vmem:[#allocation2 + $0x60] sm:$0xff] }
 0x10f   :  { %v1168_v53 = vpop.f32.mrf.mxu0  ;;  %v1216_v54 = vpop.f32.mrf.mxu1  ;;  %v154_v45 = vld [vmem:[#allocation2 + $0xa0] sm:$0xff] }
 0x110   :  { %v613_v55 = vadd.f32 %v1167_v51, %v132_v47  ;;  %v629_v56 = vadd.f32 %v1215_v52, %v148_v49 }
 0x111   :  { %v1169_v58 = vpop.f32.mrf.mxu0  ;;  %v1217_v60 = vpop.f32.mrf.mxu1 }
 0x112   :  { %645 = vst [vmem:[#allocation2 + $0x30] sm:$0xff] %v613_v55  ;;  %661 = vst [vmem:[#allocation2 + $0x70] sm:$0xff] %v629_v56  ;;  %v1170_v61 = vadd.f32 %v1169_v58, %v1168_v53  ;;  %v1218_v62 = vadd.f32 %v1217_v60, %v1216_v54  ;;  %v139_v53 = vld [vmem:[#allocation2 + $0xf0] sm:$0xff]  ;;  %v155_v55 = vld [vmem:[#allocation2 + $0xf8] sm:$0xff] }
 0x113   :  { %v1171_v63 = vpop.f32.mrf.mxu0  ;;  %v1219_v0 = vpop.f32.mrf.mxu1 }
 0x114   :  { %v614_v1 = vadd.f32 %v1170_v61, %v133_v57  ;;  %v630_v2 = vadd.f32 %v1218_v62, %v149_v59 }
 0x115   :  { %v1172_v4 = vpop.f32.mrf.mxu0  ;;  %v1220_v6 = vpop.f32.mrf.mxu1 }
 0x116   :  { %646 = vst [vmem:[#allocation2 + $0x48] sm:$0xff] %v614_v1  ;;  %662 = vst [vmem:[#allocation2 + $0xc0] sm:$0xff] %v630_v2  ;;  %v1173_v7 = vadd.f32 %v1172_v4, %v1171_v63  ;;  %v1221_v8 = vadd.f32 %v1220_v6, %v1219_v0  ;;  %v140_v63 = vld [vmem:[#allocation2 + $0x8] sm:$0xff]  ;;  %v156_v1 = vld [vmem:[#allocation2 + $0x20] sm:$0xff] }
 0x117   :  { %v1174_v9 = vpop.f32.mrf.mxu0  ;;  %v1222_v10 = vpop.f32.mrf.mxu1 }
 0x118   :  { %v615_v11 = vadd.f32 %v1173_v7, %v134_v3  ;;  %v631_v12 = vadd.f32 %v1221_v8, %v150_v5 }
 0x119   :  { %v1175_v14 = vpop.f32.mrf.mxu0  ;;  %v1223_v16 = vpop.f32.mrf.mxu1 }
 0x11a   :  { %647 = vst [vmem:[#allocation2 + $0x80] sm:$0xff] %v615_v11  ;;  %663 = vst [vmem:[#allocation2 + $0xa8] sm:$0xff] %v631_v12  ;;  %v1176_v17 = vadd.f32 %v1175_v14, %v1174_v9  ;;  %v1224_v18 = vadd.f32 %v1223_v16, %v1222_v10  ;;  %v141_v9 = vld [vmem:[#allocation2 + $0x78] sm:$0xff] }
 0x11b   :  { %v1177_v19 = vpop.f32.mrf.mxu0  ;;  %v1225_v20 = vpop.f32.mrf.mxu1  ;;  %v157_v11 = vld [vmem:[#allocation2 + $0x98] sm:$0xff] }
 0x11c   :  { %v616_v21 = vadd.f32 %v1176_v17, %v135_v13  ;;  %v632_v22 = vadd.f32 %v1224_v18, %v151_v15 }
 0x11d   :  { %v1178_v24 = vpop.f32.mrf.mxu0  ;;  %v1226_v26 = vpop.f32.mrf.mxu1 }
 0x11e   :  { %648 = vst [vmem:[#allocation2 + $0x88] sm:$0xff] %v616_v21  ;;  %664 = vst [vmem:[#allocation2 + $0xd0] sm:$0xff] %v632_v22  ;;  %v1179_v27 = vadd.f32 %v1178_v24, %v1177_v19  ;;  %v1227_v28 = vadd.f32 %v1226_v26, %v1225_v20 }
 0x11f   :  { %v1180_v29 = vpop.f32.mrf.mxu0  ;;  %v1228_v30 = vpop.f32.mrf.mxu1 }
 0x120   :  { %v617_v31 = vadd.f32 %v1179_v27, %v136_v23  ;;  %v633_v32 = vadd.f32 %v1227_v28, %v152_v25 }
 0x121   :  { %v1181_v34 = vpop.f32.mrf.mxu0  ;;  %v1229_v36 = vpop.f32.mrf.mxu1 }
 0x122   :  { %649 = vst [vmem:[#allocation2 + $0xe8] sm:$0xff] %v617_v31  ;;  %665 = vst [vmem:[#allocation2 + $0x10] sm:$0xff] %v633_v32  ;;  %v1182_v37 = vadd.f32 %v1181_v34, %v1180_v29  ;;  %v1230_v38 = vadd.f32 %v1229_v36, %v1228_v30 }
 0x123   :  { %v1183_v39 = vpop.f32.mrf.mxu0  ;;  %v1231_v40 = vpop.f32.mrf.mxu1 }
 0x124   :  { %v618_v41 = vadd.f32 %v1182_v37, %v137_v33  ;;  %v634_v42 = vadd.f32 %v1230_v38, %v153_v35 }
 0x125   :  { %v1184_v44 = vpop.f32.mrf.mxu0  ;;  %v1232_v46 = vpop.f32.mrf.mxu1 }
 0x126   :  { %650 = vst [vmem:[#allocation2 + $0xb8] sm:$0xff] %v618_v41  ;;  %666 = vst [vmem:[#allocation2 + $0x28] sm:$0xff] %v634_v42  ;;  %v1185_v47 = vadd.f32 %v1184_v44, %v1183_v39  ;;  %v1233_v48 = vadd.f32 %v1232_v46, %v1231_v40 }
 0x127   :  { %v1186_v49 = vpop.f32.mrf.mxu0  ;;  %v1234_v50 = vpop.f32.mrf.mxu1 }
 0x128   :  { %v619_v51 = vadd.f32 %v1185_v47, %v138_v43  ;;  %v635_v52 = vadd.f32 %v1233_v48, %v154_v45 }
 0x129   :  { %v1187_v54 = vpop.f32.mrf.mxu0  ;;  %v1235_v56 = vpop.f32.mrf.mxu1 }
 0x12a   :  { %651 = vst [vmem:[#allocation2 + $0x60] sm:$0xff] %v619_v51  ;;  %667 = vst [vmem:[#allocation2 + $0xa0] sm:$0xff] %v635_v52  ;;  %v1188_v57 = vadd.f32 %v1187_v54, %v1186_v49  ;;  %v1236_v58 = vadd.f32 %v1235_v56, %v1234_v50 }
 0x12b   :  { %v1189_v59 = vpop.f32.mrf.mxu0  ;;  %v1237_v60 = vpop.f32.mrf.mxu1 }
 0x12c   :  { %v620_v61 = vadd.f32 %v1188_v57, %v139_v53  ;;  %v636_v62 = vadd.f32 %v1236_v58, %v155_v55 }
 0x12d   :  { %v1190_v0 = vpop.f32.mrf.mxu0  ;;  %v1238_v2 = vpop.f32.mrf.mxu1 }
 0x12e   :  { %652 = vst [vmem:[#allocation2 + $0xf0] sm:$0xff] %v620_v61  ;;  %668 = vst [vmem:[#allocation2 + $0xf8] sm:$0xff] %v636_v62  ;;  %v1191_v3 = vadd.f32 %v1190_v0, %v1189_v59  ;;  %v1239_v4 = vadd.f32 %v1238_v2, %v1237_v60 }
 0x12f   :  { %v1192_v5 = vpop.f32.mrf.mxu0  ;;  %v1240_v6 = vpop.f32.mrf.mxu1 }
 0x130   :  { %v621_v7 = vadd.f32 %v1191_v3, %v140_v63  ;;  %v637_v8 = vadd.f32 %v1239_v4, %v156_v1 }
 0x131   :  { %v1193_v10 = vpop.f32.mrf.mxu0  ;;  %v1241_v12 = vpop.f32.mrf.mxu1 }
 0x132   :  { %653 = vst [vmem:[#allocation2 + $0x8] sm:$0xff] %v621_v7  ;;  %669 = vst [vmem:[#allocation2 + $0x20] sm:$0xff] %v637_v8  ;;  %v1194_v13 = vadd.f32 %v1193_v10, %v1192_v5  ;;  %v1242_v14 = vadd.f32 %v1241_v12, %v1240_v6 }
 0x134   :  { %v622_v15 = vadd.f32 %v1194_v13, %v141_v9  ;;  %v638_v16 = vadd.f32 %v1242_v14, %v157_v11 }
 0x136   :  { %654 = vst [vmem:[#allocation2 + $0x78] sm:$0xff] %v622_v15  ;;  %670 = vst [vmem:[#allocation2 + $0x98] sm:$0xff] %v638_v16 }
 0x137 PF:  { %v674_v17 = vld [vmem:[#allocation2 + $0xb0] sm:$0xff]  ;;  %v675_v18 = vld [vmem:[#allocation2] sm:$0xff]  ;;  %v676_v22 = vld [vmem:[#allocation2 + $0xd8] sm:$0xff] }
 0x138   :  { %v1433_v19 = vld [vmem:[%s1518_s4] ss:$0 sm:$0xff]  ;;  %v677_v23 = vld [vmem:[#allocation2 + $0x18] sm:$0xff]  ;;  %v678_v24 = vld [vmem:[#allocation2 + $0x50] sm:$0xff] }
 0x139   :  { %v713_v20 = vadd.f32 %v1433_v19, %v674_v17  ;;  %v714_v21 = vadd.f32 %v1433_v19, %v675_v18  ;;  %v715_v25 = vadd.f32 %v1433_v19, %v676_v22  ;;  %v716_v26 = vadd.f32 %v1433_v19, %v677_v23  ;;  %v679_v27 = vld [vmem:[#allocation2 + $0x68] sm:$0xff]  ;;  %v680_v29 = vld [vmem:[#allocation2 + $0x30] sm:$0xff]  ;;  %v682_v35 = vld [vmem:[#allocation2 + $0x80] sm:$0xff] }
 0x13a   :  { %v717_v28 = vadd.f32 %v1433_v19, %v678_v24  ;;  %v681_v30 = vld [vmem:[#allocation2 + $0x48] sm:$0xff]  ;;  %v718_v32 = vadd.f32 %v1433_v19, %v679_v27  ;;  %v719_v33 = vadd.f32 %v1433_v19, %v680_v29  ;;  %v721_v39 = vadd.f32 %v1433_v19, %v682_v35  ;;  %v685_v41 = vld [vmem:[#allocation2 + $0xb8] sm:$0xff]  ;;  %v686_v43 = vld [vmem:[#allocation2 + $0x60] sm:$0xff] }
 0x13b   :  { %v1039_v31 = vpack.c.bf16 %v714_v21, %v713_v20  ;;  %v720_v34 = vadd.f32 %v1433_v19, %v681_v30  ;;  %v683_v36 = vld [vmem:[#allocation2 + $0x88] sm:$0xff]  ;;  %v1044_v38 = vpack.c.bf16 %v716_v26, %v715_v25  ;;  %v687_v44 = vld [vmem:[#allocation2 + $0xf0] sm:$0xff]  ;;  %v724_v47 = vadd.f32 %v1433_v19, %v685_v41  ;;  %v690_v51 = vld [vmem:[#allocation2 + $0x38] sm:$0xff] }
 0x13c   :  { %v684_v37 = vld [vmem:[#allocation2 + $0xe8] sm:$0xff]  ;;  %v722_v40 = vadd.f32 %v1433_v19, %v683_v36  ;;  %v1049_v45 = vpack.c.bf16 %v718_v32, %v717_v28  ;;  %v725_v48 = vadd.f32 %v1433_v19, %v686_v43  ;;  %v726_v53 = vadd.f32 %v1433_v19, %v687_v44  ;;  %v691_v56 = vld [vmem:[#allocation2 + $0x58] sm:$0xff]  ;;  %v692_v57 = vld [vmem:[#allocation2 + $0x40] sm:$0xff] }
 0x13d   :  { %v723_v42 = vadd.f32 %v1433_v19, %v684_v37  ;;  %1040 = vst [vmem:[%s1519_s5] sm:$0xff] %v1039_v31   ;;  %v1054_v46 = vpack.c.bf16 %v720_v34, %v719_v33  ;;  %v688_v49 = vld [vmem:[#allocation2 + $0x8] sm:$0xff]  ;;  %v689_v50 = vld [vmem:[#allocation2 + $0x78] sm:$0xff]  ;;  %1116 = vst [vmem:[%s1519_s5 + $0x8] sm:$0xff] %v1044_v38   ;;  %v729_v60 = vadd.f32 %v1433_v19, %v690_v51 }
 0x13e   :  { %v1059_v52 = vpack.c.bf16 %v722_v40, %v721_v39  ;;  %v727_v54 = vadd.f32 %v1433_v19, %v688_v49  ;;  %v728_v55 = vadd.f32 %v1433_v19, %v689_v50  ;;  %v693_v58 = vld [vmem:[#allocation2 + $0xc8] sm:$0xff]  ;;  %1117 = vst [vmem:[%s1519_s5 + $0x10] sm:$0xff] %v1049_v45   ;;  %v730_v61 = vadd.f32 %v1433_v19, %v691_v56  ;;  %v694_v63 = vld [vmem:[#allocation2 + $0xe0] sm:$0xff]  ;;  %v695_v0 = vld [vmem:[#allocation2 + $0x90] sm:$0xff] }
 0x13f   :  { %1118 = vst [vmem:[%s1519_s5 + $0x18] sm:$0xff] %v1054_v46   ;;  %v1064_v59 = vpack.c.bf16 %v724_v47, %v723_v42  ;;  %v731_v62 = vadd.f32 %v1433_v19, %v692_v57  ;;  %v696_v1 = vld [vmem:[#allocation2 + $0x70] sm:$0xff]  ;;  %v1069_v2 = vpack.c.bf16 %v726_v53, %v725_v48  ;;  %v732_v4 = vadd.f32 %v1433_v19, %v693_v58  ;;  %v697_v6 = vld [vmem:[#allocation2 + $0xc0] sm:$0xff]  ;;  %v698_v7 = vld [vmem:[#allocation2 + $0xa8] sm:$0xff] }
 0x140   :  { %1119 = vst [vmem:[%s1519_s5 + $0x20] sm:$0xff] %v1059_v52   ;;  %v1074_v3 = vpack.c.bf16 %v728_v55, %v727_v54  ;;  %v733_v5 = vadd.f32 %v1433_v19, %v694_v63  ;;  %v699_v8 = vld [vmem:[#allocation2 + $0xd0] sm:$0xff]  ;;  %v1079_v9 = vpack.c.bf16 %v730_v61, %v729_v60  ;;  %v734_v10 = vadd.f32 %v1433_v19, %v695_v0  ;;  %v701_v14 = vld [vmem:[#allocation2 + $0x28] sm:$0xff]  ;;  %v702_v15 = vld [vmem:[#allocation2 + $0xa0] sm:$0xff] }
 0x141   :  { %1120 = vst [vmem:[%s1519_s5 + $0x28] sm:$0xff] %v1064_v59   ;;  %v735_v11 = vadd.f32 %v1433_v19, %v696_v1  ;;  %v736_v12 = vadd.f32 %v1433_v19, %v697_v6  ;;  %v700_v13 = vld [vmem:[#allocation2 + $0x10] sm:$0xff]  ;;  %1121 = vst [vmem:[%s1519_s5 + $0x30] sm:$0xff] %v1069_v2   ;;  %v1084_v16 = vpack.c.bf16 %v732_v4, %v731_v62  ;;  %v703_v21 = vld [vmem:[#allocation2 + $0xf8] sm:$0xff] }
 0x142   :  { %1122 = vst [vmem:[%s1519_s5 + $0x38] sm:$0xff] %v1074_v3   ;;  %v737_v17 = vadd.f32 %v1433_v19, %v698_v7  ;;  %v738_v18 = vadd.f32 %v1433_v19, %v699_v8  ;;  %v739_v20 = vadd.f32 %v1433_v19, %v700_v13  ;;  %v704_v22 = vld [vmem:[#allocation2 + $0x20] sm:$0xff]  ;;  %v705_v23 = vld [vmem:[#allocation2 + $0x98] sm:$0xff]  ;;  %1123 = vst [vmem:[%s1519_s5 + $0x40] sm:$0xff] %v1079_v9  }
 0x143   :  { %v1089_v24 = vpack.c.bf16 %v734_v10, %v733_v5  ;;  %v1094_v25 = vpack.c.bf16 %v736_v12, %v735_v11  ;;  %v740_v26 = vadd.f32 %v1433_v19, %v701_v14  ;;  %v741_v27 = vadd.f32 %v1433_v19, %v702_v15  ;;  %1124 = vst [vmem:[%s1519_s5 + $0x48] sm:$0xff] %v1084_v16  }
 0x144   :  { %v1099_v28 = vpack.c.bf16 %v738_v18, %v737_v17  ;;  %v742_v29 = vadd.f32 %v1433_v19, %v703_v21  ;;  %v743_v30 = vadd.f32 %v1433_v19, %v704_v22  ;;  %v744_v31 = vadd.f32 %v1433_v19, %v705_v23 }
 0x145   :  { %1125 = vst [vmem:[%s1519_s5 + $0x50] sm:$0xff] %v1089_v24   ;;  %1126 = vst [vmem:[%s1519_s5 + $0x58] sm:$0xff] %v1094_v25   ;;  %v1104_v32 = vpack.c.bf16 %v740_v26, %v739_v20 }
 0x146   :  { %1127 = vst [vmem:[%s1519_s5 + $0x60] sm:$0xff] %v1099_v28   ;;  %v1109_v33 = vpack.c.bf16 %v742_v29, %v741_v27  ;;  %v1114_v34 = vpack.c.bf16 %v744_v31, %v743_v30 }
 0x147   :  { %1128 = vst [vmem:[%s1519_s5 + $0x68] sm:$0xff] %v1104_v32  }
 0x148   :  { %1129 = vst [vmem:[%s1519_s5 + $0x70] sm:$0xff] %v1109_v33   ;;  %1130 = vst [vmem:[%s1519_s5 + $0x78] sm:$0xff] %v1114_v34  }

// kernel: gcn_forward.8
= control target key start
LH: loop header
LB: loop body
LE: loop exit
PB: predicated region body
PF: predicated region fallthrough
CT: control target
= control target key end

     0   :  { %v1356_v0 = vmov 0.0   ;;  %s1547_s0 = inlined_call_operand.<no memory space> [shape: s32[1], index: 0, kind: input, shape index: {}]   ;;  %s1548_s1 = inlined_call_operand.<no memory space> [shape: s32[1], index: 1, kind: input, shape index: {}]   ;;  %s1549_s3 = inlined_call_operand.vmem [shape: bf16[256,128], index: 3, kind: input, shape index: {}]   ;;  %s1550_s4 = inlined_call_operand.vmem [shape: f32[1,128], index: 4, kind: input, shape index: {}]   ;;  %s1551_s5 = inlined_call_operand.vmem [shape: bf16[256,128], index: 5, kind: output, shape index: {}]   ;;  %s1552_s2 = inlined_call_operand.vmem [shape: bf16[256,256], index: 2, kind: input, shape index: {}]  }
   0x1   :  { %10 = sst [smem:[#allocation4]] %s1547_s0  ;;  %s949_s22 = sshll.u32 %s1547_s0, 1  ;;  %50 = vst [vmem:[#allocation2 + $0xb0] sm:$0xff] %v1356_v0  ;;  %51 = vst [vmem:[#allocation2] sm:$0xff] %v1356_v0 }
   0x2   :  { %52 = vst [vmem:[#allocation2 + $0xd8] sm:$0xff] %v1356_v0  ;;  %53 = vst [vmem:[#allocation2 + $0x18] sm:$0xff] %v1356_v0  ;;  %p38_p0 = scmp.lt.s32.totalorder %s949_s22, 1  ;;  %p952_p1 = scmp.le.s32.totalorder %s1548_s1, 0 }
   0x3   :  { %54 = vst [vmem:[#allocation2 + $0x50] sm:$0xff] %v1356_v0  ;;  %55 = vst [vmem:[#allocation2 + $0x68] sm:$0xff] %v1356_v0  ;;  %s88_s8 = sld [smem:[#allocation4]] (!%p952_p1) }
   0x4   :  { %56 = vst [vmem:[#allocation2 + $0x30] sm:$0xff] %v1356_v0  ;;  %57 = vst [vmem:[#allocation2 + $0x48] sm:$0xff] %v1356_v0  ;;  %s1554_s22 = smov (!%p38_p0, %s949_s22), 1 }
   0x5   :  { %58 = vst [vmem:[#allocation2 + $0x80] sm:$0xff] %v1356_v0  ;;  %59 = vst [vmem:[#allocation2 + $0x88] sm:$0xff] %v1356_v0  ;;  %s950_s27 = sshll.u32 %s1554_s22, 2 }
   0x6   :  { %60 = vst [vmem:[#allocation2 + $0xe8] sm:$0xff] %v1356_v0  ;;  %61 = vst [vmem:[#allocation2 + $0xb8] sm:$0xff] %v1356_v0  ;;  %s1404_s30 = scalar_lea.vmem %s1552_s2, %s950_s27 }
   0x7   :  { %62 = vst [vmem:[#allocation2 + $0x60] sm:$0xff] %v1356_v0  ;;  %63 = vst [vmem:[#allocation2 + $0xf0] sm:$0xff] %v1356_v0 }
   0x8   :  { %64 = vst [vmem:[#allocation2 + $0x8] sm:$0xff] %v1356_v0  ;;  %65 = vst [vmem:[#allocation2 + $0x78] sm:$0xff] %v1356_v0 }
   0x9   :  { %66 = vst [vmem:[#allocation2 + $0x38] sm:$0xff] %v1356_v0  ;;  %67 = vst [vmem:[#allocation2 + $0x58] sm:$0xff] %v1356_v0  ;;  %s953_s0 = sshll.u32 (!%p952_p1), %s88_s8, 8 }
   0xa   :  { %68 = vst [vmem:[#allocation2 + $0x40] sm:$0xff] %v1356_v0  ;;  %69 = vst [vmem:[#allocation2 + $0xc8] sm:$0xff] %v1356_v0  ;;  %s90_s9 = sshra.s32 (!%p952_p1), %s953_s0, 3 }
   0xb   :  { %70 = vst [vmem:[#allocation2 + $0xe0] sm:$0xff] %v1356_v0  ;;  %71 = vst [vmem:[#allocation2 + $0x90] sm:$0xff] %v1356_v0  ;;  %s954_s10 = sshll.u32 (!%p952_p1), %s90_s9, 2 }
   0xc   :  { %72 = vst [vmem:[#allocation2 + $0x70] sm:$0xff] %v1356_v0  ;;  %73 = vst [vmem:[#allocation2 + $0xc0] sm:$0xff] %v1356_v0  ;;  %86 = sbr.rel (%p952_p1) target bundleno = 311 (0x137), region = 21  ;;  %s1414_s2 = scalar_lea.vmem (!%p952_p1), %s1549_s3, %s954_s10 }
   0xd   :  { %74 = vst [vmem:[#allocation2 + $0xa8] sm:$0xff] %v1356_v0  ;;  %75 = vst [vmem:[#allocation2 + $0xd0] sm:$0xff] %v1356_v0 }
   0xe   :  { %76 = vst [vmem:[#allocation2 + $0x10] sm:$0xff] %v1356_v0  ;;  %77 = vst [vmem:[#allocation2 + $0x28] sm:$0xff] %v1356_v0 }
   0xf   :  { %78 = vst [vmem:[#allocation2 + $0xa0] sm:$0xff] %v1356_v0  ;;  %79 = vst [vmem:[#allocation2 + $0xf8] sm:$0xff] %v1356_v0 }
  0x10   :  { %80 = vst [vmem:[#allocation2 + $0x20] sm:$0xff] %v1356_v0  ;;  %81 = vst [vmem:[#allocation2 + $0x98] sm:$0xff] %v1356_v0 }
  0x11   :  { %v1310_v1 = vld [vmem:[%s1404_s30 + $0x4] ss:$8 sps:$4 sm:$0xff]   ;;  %v1292_v3 = vld [vmem:[%s1414_s2 + $0x78] sm:$0xff]   ;;  %v1294_v5 = vld [vmem:[%s1414_s2 + $0x70] sm:$0xff]  }
  0x12   :  { %v1313_v2 = vld [vmem:[%s1404_s30 + $0x84] ss:$8 sps:$4 sm:$0xff]   ;;  %478 = vmatprep.mubr.bf16.mxu0 %v1310_v1  ;;  %v1293_v4 = vld [vmem:[%s1414_s2 + $0x38] sm:$0xff]   ;;  %1163 = vmatprep.subr.bf16.mxu0 %v1292_v3  ;;  %v1295_v6 = vld [vmem:[%s1414_s2 + $0x30] sm:$0xff]  }
  0x13   :  { %542 = vmatprep.mubr.bf16.mxu1 %v1313_v2  ;;  %1275 = vmatprep.subr.bf16.mxu1 %v1292_v3  ;;  %v1296_v7 = vld [vmem:[%s1414_s2 + $0x68] sm:$0xff]   ;;  %v1298_v9 = vld [vmem:[%s1414_s2 + $0x60] sm:$0xff]   ;;  %v1300_v11 = vld [vmem:[%s1414_s2 + $0x58] sm:$0xff]  }
  0x14   :  { %1164 = vmatpush3.bf16.msra.mxu0 %v1293_v4  ;;  %1283 = vmatpush3.bf16.msra.mxu1 %v1293_v4  ;;  %v1297_v8 = vld [vmem:[%s1414_s2 + $0x28] sm:$0xff]   ;;  %v1299_v10 = vld [vmem:[%s1414_s2 + $0x20] sm:$0xff]   ;;  %v1301_v12 = vld [vmem:[%s1414_s2 + $0x18] sm:$0xff]  }
  0x15   :  { %1165 = vmatprep.subr.bf16.mxu0 %v1294_v5  ;;  %1276 = vmatprep.subr.bf16.mxu1 %v1294_v5  ;;  %v1302_v13 = vld [vmem:[%s1414_s2 + $0x50] sm:$0xff]   ;;  %v1304_v15 = vld [vmem:[%s1414_s2 + $0x48] sm:$0xff]   ;;  %v1306_v17 = vld [vmem:[%s1414_s2 + $0x40] sm:$0xff]  }
  0x16   :  { %v1303_v14 = vld [vmem:[%s1414_s2 + $0x10] sm:$0xff]   ;;  %v1305_v16 = vld [vmem:[%s1414_s2 + $0x8] sm:$0xff]   ;;  %v1307_v18 = vld [vmem:[%s1414_s2] sm:$0xff]  }
  0x17   :  { %v1308_v19 = vld [vmem:[%s1404_s30] ss:$8 sps:$4 sm:$0xff]   ;;  %v1314_v21 = vld [vmem:[%s1404_s30 + $0x14] ss:$8 sps:$4 sm:$0xff]   ;;  %v1318_v23 = vld [vmem:[%s1404_s30 + $0x10] ss:$8 sps:$4 sm:$0xff]  }
  0x18   :  { %1166 = vmatpush3.bf16.msra.mxu0 %v1295_v6  ;;  %1284 = vmatpush3.bf16.msra.mxu1 %v1295_v6  ;;  %v1311_v20 = vld [vmem:[%s1404_s30 + $0x80] ss:$8 sps:$4 sm:$0xff]   ;;  %v1316_v22 = vld [vmem:[%s1404_s30 + $0x94] ss:$8 sps:$4 sm:$0xff]   ;;  %v1319_v24 = vld [vmem:[%s1404_s30 + $0x90] ss:$8 sps:$4 sm:$0xff]  }
  0x19   :  { %1167 = vmatprep.subr.bf16.mxu0 %v1296_v7  ;;  %1277 = vmatprep.subr.bf16.mxu1 %v1296_v7  ;;  %v1320_v25 = vld [vmem:[%s1404_s30 + $0x24] ss:$8 sps:$4 sm:$0xff]   ;;  %v1324_v27 = vld [vmem:[%s1404_s30 + $0x20] ss:$8 sps:$4 sm:$0xff]   ;;  %v1326_v29 = vld [vmem:[%s1404_s30 + $0x34] ss:$8 sps:$4 sm:$0xff]  }
  0x1a   :  { %v1322_v26 = vld [vmem:[%s1404_s30 + $0xa4] ss:$8 sps:$4 sm:$0xff]   ;;  %v1325_v28 = vld [vmem:[%s1404_s30 + $0xa0] ss:$8 sps:$4 sm:$0xff]   ;;  %v1328_v30 = vld [vmem:[%s1404_s30 + $0xb4] ss:$8 sps:$4 sm:$0xff]  }
  0x1b   :  { %v1330_v31 = vld [vmem:[%s1404_s30 + $0x30] ss:$8 sps:$4 sm:$0xff]   ;;  %v1332_v33 = vld [vmem:[%s1404_s30 + $0x44] ss:$8 sps:$4 sm:$0xff]   ;;  %v1336_v35 = vld [vmem:[%s1404_s30 + $0x40] ss:$8 sps:$4 sm:$0xff]  }
  0x1c   :  { %1168 = vmatpush3.bf16.msra.mxu0 %v1297_v8  ;;  %1285 = vmatpush3.bf16.msra.mxu1 %v1297_v8  ;;  %v1331_v32 = vld [vmem:[%s1404_s30 + $0xb0] ss:$8 sps:$4 sm:$0xff]   ;;  %v1334_v34 = vld [vmem:[%s1404_s30 + $0xc4] ss:$8 sps:$4 sm:$0xff]   ;;  %v1337_v36 = vld [vmem:[%s1404_s30 + $0xc0] ss:$8 sps:$4 sm:$0xff]  }
  0x1d   :  { %1169 = vmatprep.subr.bf16.mxu0 %v1298_v9  ;;  %1278 = vmatprep.subr.bf16.mxu1 %v1298_v9  ;;  %v1338_v37 = vld [vmem:[%s1404_s30 + $0x54] ss:$8 sps:$4 sm:$0xff]   ;;  %v1342_v39 = vld [vmem:[%s1404_s30 + $0x50] ss:$8 sps:$4 sm:$0xff]   ;;  %v1344_v41 = vld [vmem:[%s1404_s30 + $0x64] ss:$8 sps:$4 sm:$0xff]  }
  0x1e   :  { %v1340_v38 = vld [vmem:[%s1404_s30 + $0xd4] ss:$8 sps:$4 sm:$0xff]   ;;  %v1343_v40 = vld [vmem:[%s1404_s30 + $0xd0] ss:$8 sps:$4 sm:$0xff]   ;;  %v1346_v42 = vld [vmem:[%s1404_s30 + $0xe4] ss:$8 sps:$4 sm:$0xff]  }
  0x1f   :  { %v1348_v43 = vld [vmem:[%s1404_s30 + $0x60] ss:$8 sps:$4 sm:$0xff]   ;;  %v1350_v45 = vld [vmem:[%s1404_s30 + $0x74] ss:$8 sps:$4 sm:$0xff]   ;;  %v1354_v47 = vld [vmem:[%s1404_s30 + $0x70] ss:$8 sps:$4 sm:$0xff]  }
  0x20   :  { %1170 = vmatpush3.bf16.msra.mxu0 %v1299_v10  ;;  %1286 = vmatpush3.bf16.msra.mxu1 %v1299_v10  ;;  %v1349_v44 = vld [vmem:[%s1404_s30 + $0xe0] ss:$8 sps:$4 sm:$0xff]   ;;  %v1352_v46 = vld [vmem:[%s1404_s30 + $0xf4] ss:$8 sps:$4 sm:$0xff]   ;;  %v1355_v48 = vld [vmem:[%s1404_s30 + $0xf0] ss:$8 sps:$4 sm:$0xff]  }
  0x21   :  { %1171 = vmatprep.subr.bf16.mxu0 %v1300_v11  ;;  %1279 = vmatprep.subr.bf16.mxu1 %v1300_v11  ;;  %v126_v51 = vld [vmem:[#allocation2 + $0xb0] sm:$0xff]  ;;  %v142_v53 = vld [vmem:[#allocation2 + $0x38] sm:$0xff]  ;;  %v127_v61 = vld [vmem:[#allocation2] sm:$0xff] }
  0x22   :  { %v143_v63 = vld [vmem:[#allocation2 + $0x58] sm:$0xff]  ;;  %v144_v9 = vld [vmem:[#allocation2 + $0x40] sm:$0xff] }
  0x23   :  { %v128_v7 = vld [vmem:[#allocation2 + $0xd8] sm:$0xff] }
  0x24   :  { %1172 = vmatpush3.bf16.msra.mxu0 %v1301_v12  ;;  %1287 = vmatpush3.bf16.msra.mxu1 %v1301_v12 }
  0x25   :  { %1173 = vmatprep.subr.bf16.mxu0 %v1302_v13  ;;  %1280 = vmatprep.subr.bf16.mxu1 %v1302_v13 }
  0x28   :  { %1174 = vmatpush3.bf16.msra.mxu0 %v1303_v14  ;;  %1288 = vmatpush3.bf16.msra.mxu1 %v1303_v14 }
  0x29   :  { %1175 = vmatprep.subr.bf16.mxu0 %v1304_v15  ;;  %1281 = vmatprep.subr.bf16.mxu1 %v1304_v15 }
  0x2c   :  { %1176 = vmatpush3.bf16.msra.mxu0 %v1305_v16  ;;  %1289 = vmatpush3.bf16.msra.mxu1 %v1305_v16 }
  0x2d   :  { %1177 = vmatprep.subr.bf16.mxu0 %v1306_v17  ;;  %1282 = vmatprep.subr.bf16.mxu1 %v1306_v17  ;;  %v129_v17 = vld [vmem:[#allocation2 + $0x18] sm:$0xff] }
  0x30   :  { %1178 = vmatpush3.bf16.msra.mxu0 %v1307_v18  ;;  %1290 = vmatpush3.bf16.msra.mxu1 %v1307_v18 }
  0x33   :  { %479 = vmatmul.mubr.bf16.vlgmr.msra.gmra.mxu0 %v1308_v19  ;;  %543 = vmatmul.mubr.bf16.vlgmr.msra.gmra.mxu1 %v1311_v20  ;;  %v145_v19 = vld [vmem:[#allocation2 + $0xc8] sm:$0xff] }
  0x34   :  { %486 = vmatprep.mubr.bf16.mxu0 %v1314_v21  ;;  %550 = vmatprep.mubr.bf16.mxu1 %v1316_v22 }
  0x3b   :  { %487 = vmatmul.mubr.bf16.gmra.mxu0 %v1318_v23  ;;  %551 = vmatmul.mubr.bf16.gmra.mxu1 %v1319_v24 }
  0x3c   :  { %494 = vmatprep.mubr.bf16.mxu0 %v1320_v25  ;;  %558 = vmatprep.mubr.bf16.mxu1 %v1322_v26 }
  0x43   :  { %495 = vmatmul.mubr.bf16.gmra.mxu0 %v1324_v27  ;;  %559 = vmatmul.mubr.bf16.gmra.mxu1 %v1325_v28  ;;  %v130_v27 = vld [vmem:[#allocation2 + $0x50] sm:$0xff] }
  0x44   :  { %502 = vmatprep.mubr.bf16.mxu0 %v1326_v29  ;;  %566 = vmatprep.mubr.bf16.mxu1 %v1328_v30  ;;  %v146_v29 = vld [vmem:[#allocation2 + $0xe0] sm:$0xff] }
  0x4b   :  { %503 = vmatmul.mubr.bf16.gmra.mxu0 %v1330_v31  ;;  %567 = vmatmul.mubr.bf16.gmra.mxu1 %v1331_v32 }
  0x4c   :  { %510 = vmatprep.mubr.bf16.mxu0 %v1332_v33  ;;  %574 = vmatprep.mubr.bf16.mxu1 %v1334_v34 }
  0x53   :  { %511 = vmatmul.mubr.bf16.gmra.mxu0 %v1336_v35  ;;  %575 = vmatmul.mubr.bf16.gmra.mxu1 %v1337_v36 }
  0x54   :  { %518 = vmatprep.mubr.bf16.mxu0 %v1338_v37  ;;  %582 = vmatprep.mubr.bf16.mxu1 %v1340_v38  ;;  %v131_v37 = vld [vmem:[#allocation2 + $0x68] sm:$0xff] }
  0x5b   :  { %519 = vmatmul.mubr.bf16.gmra.mxu0 %v1342_v39  ;;  %583 = vmatmul.mubr.bf16.gmra.mxu1 %v1343_v40  ;;  %v147_v39 = vld [vmem:[#allocation2 + $0x90] sm:$0xff] }
  0x5c   :  { %526 = vmatprep.mubr.bf16.mxu0 %v1344_v41  ;;  %590 = vmatprep.mubr.bf16.mxu1 %v1346_v42 }
  0x63   :  { %527 = vmatmul.mubr.bf16.gmra.mxu0 %v1348_v43  ;;  %591 = vmatmul.mubr.bf16.gmra.mxu1 %v1349_v44 }
  0x64   :  { %534 = vmatprep.mubr.bf16.mxu0 %v1350_v45  ;;  %598 = vmatprep.mubr.bf16.mxu1 %v1352_v46 }
  0x6b   :  { %535 = vmatmul.mubr.bf16.gmra.mxu0 %v1354_v47  ;;  %599 = vmatmul.mubr.bf16.gmra.mxu1 %v1355_v48  ;;  %v132_v47 = vld [vmem:[#allocation2 + $0x30] sm:$0xff] }
  0xf3   :  { %v1179_v49 = vpop.f32.mrf.mxu0  ;;  %v1227_v50 = vpop.f32.mrf.mxu1 }
  0xf5   :  { %v1180_v52 = vpop.f32.mrf.mxu0  ;;  %v1228_v54 = vpop.f32.mrf.mxu1 }
  0xf6   :  { %v1181_v55 = vadd.f32 %v1180_v52, %v1179_v49  ;;  %v1229_v56 = vadd.f32 %v1228_v54, %v1227_v50  ;;  %v148_v49 = vld [vmem:[#allocation2 + $0x70] sm:$0xff] }
  0xf7   :  { %v1182_v57 = vpop.f32.mrf.mxu0  ;;  %v1230_v58 = vpop.f32.mrf.mxu1 }
  0xf8   :  { %v607_v59 = vadd.f32 %v1181_v55, %v126_v51  ;;  %v623_v60 = vadd.f32 %v1229_v56, %v142_v53 }
  0xf9   :  { %v1183_v62 = vpop.f32.mrf.mxu0  ;;  %v1231_v0 = vpop.f32.mrf.mxu1 }
  0xfa   :  { %639 = vst [vmem:[#allocation2 + $0xb0] sm:$0xff] %v607_v59  ;;  %655 = vst [vmem:[#allocation2 + $0x38] sm:$0xff] %v623_v60  ;;  %v1184_v1 = vadd.f32 %v1183_v62, %v1182_v57  ;;  %v1232_v2 = vadd.f32 %v1231_v0, %v1230_v58  ;;  %v133_v57 = vld [vmem:[#allocation2 + $0x48] sm:$0xff]  ;;  %v149_v59 = vld [vmem:[#allocation2 + $0xc0] sm:$0xff] }
  0xfb   :  { %v1185_v3 = vpop.f32.mrf.mxu0  ;;  %v1233_v4 = vpop.f32.mrf.mxu1 }
  0xfc   :  { %v608_v5 = vadd.f32 %v1184_v1, %v127_v61  ;;  %v624_v6 = vadd.f32 %v1232_v2, %v143_v63 }
  0xfd   :  { %v1186_v8 = vpop.f32.mrf.mxu0  ;;  %v1234_v10 = vpop.f32.mrf.mxu1 }
  0xfe   :  { %640 = vst [vmem:[#allocation2] sm:$0xff] %v608_v5  ;;  %656 = vst [vmem:[#allocation2 + $0x58] sm:$0xff] %v624_v6  ;;  %v1187_v11 = vadd.f32 %v1186_v8, %v1185_v3  ;;  %v1235_v12 = vadd.f32 %v1234_v10, %v1233_v4  ;;  %v134_v3 = vld [vmem:[#allocation2 + $0x80] sm:$0xff]  ;;  %v150_v5 = vld [vmem:[#allocation2 + $0xa8] sm:$0xff] }
  0xff   :  { %v1188_v13 = vpop.f32.mrf.mxu0  ;;  %v1236_v14 = vpop.f32.mrf.mxu1 }
 0x100   :  { %v609_v15 = vadd.f32 %v1187_v11, %v128_v7  ;;  %v625_v16 = vadd.f32 %v1235_v12, %v144_v9 }
 0x101   :  { %v1189_v18 = vpop.f32.mrf.mxu0  ;;  %v1237_v20 = vpop.f32.mrf.mxu1 }
 0x102   :  { %641 = vst [vmem:[#allocation2 + $0xd8] sm:$0xff] %v609_v15  ;;  %657 = vst [vmem:[#allocation2 + $0x40] sm:$0xff] %v625_v16  ;;  %v1190_v21 = vadd.f32 %v1189_v18, %v1188_v13  ;;  %v1238_v22 = vadd.f32 %v1237_v20, %v1236_v14  ;;  %v135_v13 = vld [vmem:[#allocation2 + $0x88] sm:$0xff]  ;;  %v151_v15 = vld [vmem:[#allocation2 + $0xd0] sm:$0xff] }
 0x103   :  { %v1191_v23 = vpop.f32.mrf.mxu0  ;;  %v1239_v24 = vpop.f32.mrf.mxu1 }
 0x104   :  { %v610_v25 = vadd.f32 %v1190_v21, %v129_v17  ;;  %v626_v26 = vadd.f32 %v1238_v22, %v145_v19 }
 0x105   :  { %v1192_v28 = vpop.f32.mrf.mxu0  ;;  %v1240_v30 = vpop.f32.mrf.mxu1 }
 0x106   :  { %642 = vst [vmem:[#allocation2 + $0x18] sm:$0xff] %v610_v25  ;;  %658 = vst [vmem:[#allocation2 + $0xc8] sm:$0xff] %v626_v26  ;;  %v1193_v31 = vadd.f32 %v1192_v28, %v1191_v23  ;;  %v1241_v32 = vadd.f32 %v1240_v30, %v1239_v24  ;;  %v136_v23 = vld [vmem:[#allocation2 + $0xe8] sm:$0xff]  ;;  %v152_v25 = vld [vmem:[#allocation2 + $0x10] sm:$0xff] }
 0x107   :  { %v1194_v33 = vpop.f32.mrf.mxu0  ;;  %v1242_v34 = vpop.f32.mrf.mxu1 }
 0x108   :  { %v611_v35 = vadd.f32 %v1193_v31, %v130_v27  ;;  %v627_v36 = vadd.f32 %v1241_v32, %v146_v29 }
 0x109   :  { %v1195_v38 = vpop.f32.mrf.mxu0  ;;  %v1243_v40 = vpop.f32.mrf.mxu1 }
 0x10a   :  { %643 = vst [vmem:[#allocation2 + $0x50] sm:$0xff] %v611_v35  ;;  %659 = vst [vmem:[#allocation2 + $0xe0] sm:$0xff] %v627_v36  ;;  %v1196_v41 = vadd.f32 %v1195_v38, %v1194_v33  ;;  %v1244_v42 = vadd.f32 %v1243_v40, %v1242_v34  ;;  %v137_v33 = vld [vmem:[#allocation2 + $0xb8] sm:$0xff]  ;;  %v153_v35 = vld [vmem:[#allocation2 + $0x28] sm:$0xff] }
 0x10b   :  { %v1197_v43 = vpop.f32.mrf.mxu0  ;;  %v1245_v44 = vpop.f32.mrf.mxu1 }
 0x10c   :  { %v612_v45 = vadd.f32 %v1196_v41, %v131_v37  ;;  %v628_v46 = vadd.f32 %v1244_v42, %v147_v39 }
 0x10d   :  { %v1198_v48 = vpop.f32.mrf.mxu0  ;;  %v1246_v50 = vpop.f32.mrf.mxu1 }
 0x10e   :  { %644 = vst [vmem:[#allocation2 + $0x68] sm:$0xff] %v612_v45  ;;  %660 = vst [vmem:[#allocation2 + $0x90] sm:$0xff] %v628_v46  ;;  %v1199_v51 = vadd.f32 %v1198_v48, %v1197_v43  ;;  %v1247_v52 = vadd.f32 %v1246_v50, %v1245_v44  ;;  %v138_v43 = vld [vmem:[#allocation2 + $0x60] sm:$0xff] }
 0x10f   :  { %v1200_v53 = vpop.f32.mrf.mxu0  ;;  %v1248_v54 = vpop.f32.mrf.mxu1  ;;  %v154_v45 = vld [vmem:[#allocation2 + $0xa0] sm:$0xff] }
 0x110   :  { %v613_v55 = vadd.f32 %v1199_v51, %v132_v47  ;;  %v629_v56 = vadd.f32 %v1247_v52, %v148_v49 }
 0x111   :  { %v1201_v58 = vpop.f32.mrf.mxu0  ;;  %v1249_v60 = vpop.f32.mrf.mxu1 }
 0x112   :  { %645 = vst [vmem:[#allocation2 + $0x30] sm:$0xff] %v613_v55  ;;  %661 = vst [vmem:[#allocation2 + $0x70] sm:$0xff] %v629_v56  ;;  %v1202_v61 = vadd.f32 %v1201_v58, %v1200_v53  ;;  %v1250_v62 = vadd.f32 %v1249_v60, %v1248_v54  ;;  %v139_v53 = vld [vmem:[#allocation2 + $0xf0] sm:$0xff]  ;;  %v155_v55 = vld [vmem:[#allocation2 + $0xf8] sm:$0xff] }
 0x113   :  { %v1203_v63 = vpop.f32.mrf.mxu0  ;;  %v1251_v0 = vpop.f32.mrf.mxu1 }
 0x114   :  { %v614_v1 = vadd.f32 %v1202_v61, %v133_v57  ;;  %v630_v2 = vadd.f32 %v1250_v62, %v149_v59 }
 0x115   :  { %v1204_v4 = vpop.f32.mrf.mxu0  ;;  %v1252_v6 = vpop.f32.mrf.mxu1 }
 0x116   :  { %646 = vst [vmem:[#allocation2 + $0x48] sm:$0xff] %v614_v1  ;;  %662 = vst [vmem:[#allocation2 + $0xc0] sm:$0xff] %v630_v2  ;;  %v1205_v7 = vadd.f32 %v1204_v4, %v1203_v63  ;;  %v1253_v8 = vadd.f32 %v1252_v6, %v1251_v0  ;;  %v140_v63 = vld [vmem:[#allocation2 + $0x8] sm:$0xff]  ;;  %v156_v1 = vld [vmem:[#allocation2 + $0x20] sm:$0xff] }
 0x117   :  { %v1206_v9 = vpop.f32.mrf.mxu0  ;;  %v1254_v10 = vpop.f32.mrf.mxu1 }
 0x118   :  { %v615_v11 = vadd.f32 %v1205_v7, %v134_v3  ;;  %v631_v12 = vadd.f32 %v1253_v8, %v150_v5 }
 0x119   :  { %v1207_v14 = vpop.f32.mrf.mxu0  ;;  %v1255_v16 = vpop.f32.mrf.mxu1 }
 0x11a   :  { %647 = vst [vmem:[#allocation2 + $0x80] sm:$0xff] %v615_v11  ;;  %663 = vst [vmem:[#allocation2 + $0xa8] sm:$0xff] %v631_v12  ;;  %v1208_v17 = vadd.f32 %v1207_v14, %v1206_v9  ;;  %v1256_v18 = vadd.f32 %v1255_v16, %v1254_v10  ;;  %v141_v9 = vld [vmem:[#allocation2 + $0x78] sm:$0xff] }
 0x11b   :  { %v1209_v19 = vpop.f32.mrf.mxu0  ;;  %v1257_v20 = vpop.f32.mrf.mxu1  ;;  %v157_v11 = vld [vmem:[#allocation2 + $0x98] sm:$0xff] }
 0x11c   :  { %v616_v21 = vadd.f32 %v1208_v17, %v135_v13  ;;  %v632_v22 = vadd.f32 %v1256_v18, %v151_v15 }
 0x11d   :  { %v1210_v24 = vpop.f32.mrf.mxu0  ;;  %v1258_v26 = vpop.f32.mrf.mxu1 }
 0x11e   :  { %648 = vst [vmem:[#allocation2 + $0x88] sm:$0xff] %v616_v21  ;;  %664 = vst [vmem:[#allocation2 + $0xd0] sm:$0xff] %v632_v22  ;;  %v1211_v27 = vadd.f32 %v1210_v24, %v1209_v19  ;;  %v1259_v28 = vadd.f32 %v1258_v26, %v1257_v20 }
 0x11f   :  { %v1212_v29 = vpop.f32.mrf.mxu0  ;;  %v1260_v30 = vpop.f32.mrf.mxu1 }
 0x120   :  { %v617_v31 = vadd.f32 %v1211_v27, %v136_v23  ;;  %v633_v32 = vadd.f32 %v1259_v28, %v152_v25 }
 0x121   :  { %v1213_v34 = vpop.f32.mrf.mxu0  ;;  %v1261_v36 = vpop.f32.mrf.mxu1 }
 0x122   :  { %649 = vst [vmem:[#allocation2 + $0xe8] sm:$0xff] %v617_v31  ;;  %665 = vst [vmem:[#allocation2 + $0x10] sm:$0xff] %v633_v32  ;;  %v1214_v37 = vadd.f32 %v1213_v34, %v1212_v29  ;;  %v1262_v38 = vadd.f32 %v1261_v36, %v1260_v30 }
 0x123   :  { %v1215_v39 = vpop.f32.mrf.mxu0  ;;  %v1263_v40 = vpop.f32.mrf.mxu1 }
 0x124   :  { %v618_v41 = vadd.f32 %v1214_v37, %v137_v33  ;;  %v634_v42 = vadd.f32 %v1262_v38, %v153_v35 }
 0x125   :  { %v1216_v44 = vpop.f32.mrf.mxu0  ;;  %v1264_v46 = vpop.f32.mrf.mxu1 }
 0x126   :  { %650 = vst [vmem:[#allocation2 + $0xb8] sm:$0xff] %v618_v41  ;;  %666 = vst [vmem:[#allocation2 + $0x28] sm:$0xff] %v634_v42  ;;  %v1217_v47 = vadd.f32 %v1216_v44, %v1215_v39  ;;  %v1265_v48 = vadd.f32 %v1264_v46, %v1263_v40 }
 0x127   :  { %v1218_v49 = vpop.f32.mrf.mxu0  ;;  %v1266_v50 = vpop.f32.mrf.mxu1 }
 0x128   :  { %v619_v51 = vadd.f32 %v1217_v47, %v138_v43  ;;  %v635_v52 = vadd.f32 %v1265_v48, %v154_v45 }
 0x129   :  { %v1219_v54 = vpop.f32.mrf.mxu0  ;;  %v1267_v56 = vpop.f32.mrf.mxu1 }
 0x12a   :  { %651 = vst [vmem:[#allocation2 + $0x60] sm:$0xff] %v619_v51  ;;  %667 = vst [vmem:[#allocation2 + $0xa0] sm:$0xff] %v635_v52  ;;  %v1220_v57 = vadd.f32 %v1219_v54, %v1218_v49  ;;  %v1268_v58 = vadd.f32 %v1267_v56, %v1266_v50 }
 0x12b   :  { %v1221_v59 = vpop.f32.mrf.mxu0  ;;  %v1269_v60 = vpop.f32.mrf.mxu1 }
 0x12c   :  { %v620_v61 = vadd.f32 %v1220_v57, %v139_v53  ;;  %v636_v62 = vadd.f32 %v1268_v58, %v155_v55 }
 0x12d   :  { %v1222_v0 = vpop.f32.mrf.mxu0  ;;  %v1270_v2 = vpop.f32.mrf.mxu1 }
 0x12e   :  { %652 = vst [vmem:[#allocation2 + $0xf0] sm:$0xff] %v620_v61  ;;  %668 = vst [vmem:[#allocation2 + $0xf8] sm:$0xff] %v636_v62  ;;  %v1223_v3 = vadd.f32 %v1222_v0, %v1221_v59  ;;  %v1271_v4 = vadd.f32 %v1270_v2, %v1269_v60 }
 0x12f   :  { %v1224_v5 = vpop.f32.mrf.mxu0  ;;  %v1272_v6 = vpop.f32.mrf.mxu1 }
 0x130   :  { %v621_v7 = vadd.f32 %v1223_v3, %v140_v63  ;;  %v637_v8 = vadd.f32 %v1271_v4, %v156_v1 }
 0x131   :  { %v1225_v10 = vpop.f32.mrf.mxu0  ;;  %v1273_v12 = vpop.f32.mrf.mxu1 }
 0x132   :  { %653 = vst [vmem:[#allocation2 + $0x8] sm:$0xff] %v621_v7  ;;  %669 = vst [vmem:[#allocation2 + $0x20] sm:$0xff] %v637_v8  ;;  %v1226_v13 = vadd.f32 %v1225_v10, %v1224_v5  ;;  %v1274_v14 = vadd.f32 %v1273_v12, %v1272_v6 }
 0x134   :  { %v622_v15 = vadd.f32 %v1226_v13, %v141_v9  ;;  %v638_v16 = vadd.f32 %v1274_v14, %v157_v11 }
 0x136   :  { %654 = vst [vmem:[#allocation2 + $0x78] sm:$0xff] %v622_v15  ;;  %670 = vst [vmem:[#allocation2 + $0x98] sm:$0xff] %v638_v16 }
 0x137 PF:  { %v674_v17 = vld [vmem:[#allocation2 + $0xb0] sm:$0xff]  ;;  %v675_v18 = vld [vmem:[#allocation2] sm:$0xff]  ;;  %v676_v22 = vld [vmem:[#allocation2 + $0xd8] sm:$0xff] }
 0x138   :  { %v1465_v19 = vld [vmem:[%s1550_s4] ss:$0 sm:$0xff]  ;;  %v677_v23 = vld [vmem:[#allocation2 + $0x18] sm:$0xff]  ;;  %v678_v24 = vld [vmem:[#allocation2 + $0x50] sm:$0xff] }
 0x139   :  { %v713_v20 = vadd.f32 %v1465_v19, %v674_v17  ;;  %v714_v21 = vadd.f32 %v1465_v19, %v675_v18  ;;  %v715_v25 = vadd.f32 %v1465_v19, %v676_v22  ;;  %v716_v26 = vadd.f32 %v1465_v19, %v677_v23  ;;  %v679_v27 = vld [vmem:[#allocation2 + $0x68] sm:$0xff]  ;;  %v680_v29 = vld [vmem:[#allocation2 + $0x30] sm:$0xff]  ;;  %v682_v35 = vld [vmem:[#allocation2 + $0x80] sm:$0xff] }
 0x13a   :  { %v717_v28 = vadd.f32 %v1465_v19, %v678_v24  ;;  %v681_v30 = vld [vmem:[#allocation2 + $0x48] sm:$0xff]  ;;  %v718_v33 = vadd.f32 %v1465_v19, %v679_v27  ;;  %v719_v34 = vadd.f32 %v1465_v19, %v680_v29  ;;  %v685_v42 = vld [vmem:[#allocation2 + $0xb8] sm:$0xff]  ;;  %v686_v43 = vld [vmem:[#allocation2 + $0x60] sm:$0xff]  ;;  %v721_v47 = vadd.f32 %v1465_v19, %v682_v35 }
 0x13b   :  { %v745_v31 = vmax.f32 %v713_v20, 0.0  ;;  %v746_v32 = vmax.f32 %v714_v21, 0.0  ;;  %v683_v36 = vld [vmem:[#allocation2 + $0x88] sm:$0xff]  ;;  %v747_v38 = vmax.f32 %v715_v25, 0.0  ;;  %v748_v39 = vmax.f32 %v716_v26, 0.0  ;;  %v687_v48 = vld [vmem:[#allocation2 + $0xf0] sm:$0xff] }
 0x13c   :  { %v684_v37 = vld [vmem:[#allocation2 + $0xe8] sm:$0xff]  ;;  %v749_v40 = vmax.f32 %v717_v28, 0.0  ;;  %v720_v41 = vadd.f32 %v1465_v19, %v681_v30  ;;  %v750_v45 = vmax.f32 %v718_v33, 0.0  ;;  %v751_v46 = vmax.f32 %v719_v34, 0.0  ;;  %v690_v59 = vld [vmem:[#allocation2 + $0x38] sm:$0xff]  ;;  %v692_v1 = vld [vmem:[#allocation2 + $0x40] sm:$0xff] }
 0x13d   :  { %v1071_v44 = vpack.c.bf16 %v746_v32, %v745_v31  ;;  %v1076_v49 = vpack.c.bf16 %v748_v39, %v747_v38  ;;  %v722_v51 = vadd.f32 %v1465_v19, %v683_v36  ;;  %v723_v52 = vadd.f32 %v1465_v19, %v684_v37  ;;  %v688_v53 = vld [vmem:[#allocation2 + $0x8] sm:$0xff]  ;;  %v689_v54 = vld [vmem:[#allocation2 + $0x78] sm:$0xff]  ;;  %v694_v11 = vld [vmem:[#allocation2 + $0xe0] sm:$0xff] }
 0x13e   :  { %v752_v50 = vmax.f32 %v720_v41, 0.0  ;;  %v1081_v55 = vpack.c.bf16 %v750_v45, %v749_v40  ;;  %v753_v56 = vmax.f32 %v721_v47, 0.0  ;;  %v724_v57 = vadd.f32 %v1465_v19, %v685_v42  ;;  %v691_v60 = vld [vmem:[#allocation2 + $0x58] sm:$0xff]  ;;  %v693_v6 = vld [vmem:[#allocation2 + $0xc8] sm:$0xff]  ;;  %v695_v12 = vld [vmem:[#allocation2 + $0x90] sm:$0xff] }
 0x13f   :  { %1072 = vst [vmem:[%s1551_s5] sm:$0xff] %v1071_v44   ;;  %v725_v58 = vadd.f32 %v1465_v19, %v686_v43  ;;  %1148 = vst [vmem:[%s1551_s5 + $0x8] sm:$0xff] %v1076_v49   ;;  %v754_v62 = vmax.f32 %v722_v51, 0.0  ;;  %v755_v63 = vmax.f32 %v723_v52, 0.0  ;;  %v726_v0 = vadd.f32 %v1465_v19, %v687_v48  ;;  %v696_v17 = vld [vmem:[#allocation2 + $0x70] sm:$0xff]  ;;  %v697_v18 = vld [vmem:[#allocation2 + $0xc0] sm:$0xff] }
 0x140   :  { %v1086_v61 = vpack.c.bf16 %v752_v50, %v751_v46  ;;  %1149 = vst [vmem:[%s1551_s5 + $0x10] sm:$0xff] %v1081_v55   ;;  %v756_v2 = vmax.f32 %v724_v57, 0.0  ;;  %v727_v4 = vadd.f32 %v1465_v19, %v688_v53  ;;  %v728_v5 = vadd.f32 %v1465_v19, %v689_v54  ;;  %v698_v24 = vld [vmem:[#allocation2 + $0xa8] sm:$0xff]  ;;  %v699_v25 = vld [vmem:[#allocation2 + $0xd0] sm:$0xff]  ;;  %v702_v40 = vld [vmem:[#allocation2 + $0xa0] sm:$0xff] }
 0x141   :  { %v757_v3 = vmax.f32 %v725_v58, 0.0  ;;  %v1091_v7 = vpack.c.bf16 %v754_v62, %v753_v56  ;;  %v758_v8 = vmax.f32 %v726_v0, 0.0  ;;  %v729_v9 = vadd.f32 %v1465_v19, %v690_v59  ;;  %v700_v30 = vld [vmem:[#allocation2 + $0x10] sm:$0xff]  ;;  %v701_v35 = vld [vmem:[#allocation2 + $0x28] sm:$0xff]  ;;  %v703_v41 = vld [vmem:[#allocation2 + $0xf8] sm:$0xff] }
 0x142   :  { %1150 = vst [vmem:[%s1551_s5 + $0x18] sm:$0xff] %v1086_v61   ;;  %v730_v10 = vadd.f32 %v1465_v19, %v691_v60  ;;  %v1096_v13 = vpack.c.bf16 %v756_v2, %v755_v63  ;;  %v759_v14 = vmax.f32 %v727_v4, 0.0  ;;  %v760_v15 = vmax.f32 %v728_v5, 0.0  ;;  %v704_v46 = vld [vmem:[#allocation2 + $0x20] sm:$0xff]  ;;  %v705_v47 = vld [vmem:[#allocation2 + $0x98] sm:$0xff] }
 0x143   :  { %v731_v16 = vadd.f32 %v1465_v19, %v692_v1  ;;  %1151 = vst [vmem:[%s1551_s5 + $0x20] sm:$0xff] %v1091_v7   ;;  %v1101_v20 = vpack.c.bf16 %v758_v8, %v757_v3  ;;  %v761_v21 = vmax.f32 %v729_v9, 0.0  ;;  %v732_v23 = vadd.f32 %v1465_v19, %v693_v6 }
 0x144   :  { %v762_v22 = vmax.f32 %v730_v10, 0.0  ;;  %1152 = vst [vmem:[%s1551_s5 + $0x28] sm:$0xff] %v1096_v13   ;;  %v1106_v26 = vpack.c.bf16 %v760_v15, %v759_v14  ;;  %v733_v28 = vadd.f32 %v1465_v19, %v694_v11  ;;  %v734_v29 = vadd.f32 %v1465_v19, %v695_v12 }
 0x145   :  { %v763_v27 = vmax.f32 %v731_v16, 0.0  ;;  %1153 = vst [vmem:[%s1551_s5 + $0x30] sm:$0xff] %v1101_v20   ;;  %v764_v32 = vmax.f32 %v732_v23, 0.0  ;;  %v735_v33 = vadd.f32 %v1465_v19, %v696_v17  ;;  %v736_v34 = vadd.f32 %v1465_v19, %v697_v18 }
 0x146   :  { %v1111_v31 = vpack.c.bf16 %v762_v22, %v761_v21  ;;  %1154 = vst [vmem:[%s1551_s5 + $0x38] sm:$0xff] %v1106_v26   ;;  %v765_v36 = vmax.f32 %v733_v28, 0.0  ;;  %v766_v37 = vmax.f32 %v734_v29, 0.0  ;;  %v737_v38 = vadd.f32 %v1465_v19, %v698_v24 }
 0x147   :  { %v738_v39 = vadd.f32 %v1465_v19, %v699_v25  ;;  %v1116_v42 = vpack.c.bf16 %v764_v32, %v763_v27  ;;  %v767_v43 = vmax.f32 %v735_v33, 0.0  ;;  %v768_v44 = vmax.f32 %v736_v34, 0.0 }
 0x148   :  { %1155 = vst [vmem:[%s1551_s5 + $0x40] sm:$0xff] %v1111_v31   ;;  %v739_v45 = vadd.f32 %v1465_v19, %v700_v30  ;;  %v1121_v48 = vpack.c.bf16 %v766_v37, %v765_v36  ;;  %v769_v49 = vmax.f32 %v737_v38, 0.0  ;;  %v740_v51 = vadd.f32 %v1465_v19, %v701_v35 }
 0x149   :  { %v770_v50 = vmax.f32 %v738_v39, 0.0  ;;  %1156 = vst [vmem:[%s1551_s5 + $0x48] sm:$0xff] %v1116_v42   ;;  %v1126_v52 = vpack.c.bf16 %v768_v44, %v767_v43  ;;  %v741_v54 = vadd.f32 %v1465_v19, %v702_v40  ;;  %v742_v55 = vadd.f32 %v1465_v19, %v703_v41 }
 0x14a   :  { %v771_v53 = vmax.f32 %v739_v45, 0.0  ;;  %1157 = vst [vmem:[%s1551_s5 + $0x50] sm:$0xff] %v1121_v48   ;;  %v772_v57 = vmax.f32 %v740_v51, 0.0  ;;  %v743_v58 = vadd.f32 %v1465_v19, %v704_v46  ;;  %v744_v59 = vadd.f32 %v1465_v19, %v705_v47 }
 0x14b   :  { %v1131_v56 = vpack.c.bf16 %v770_v50, %v769_v49  ;;  %1158 = vst [vmem:[%s1551_s5 + $0x58] sm:$0xff] %v1126_v52   ;;  %v773_v60 = vmax.f32 %v741_v54, 0.0  ;;  %v774_v61 = vmax.f32 %v742_v55, 0.0 }
 0x14c   :  { %v1136_v62 = vpack.c.bf16 %v772_v57, %v771_v53  ;;  %v775_v63 = vmax.f32 %v743_v58, 0.0  ;;  %v776_v0 = vmax.f32 %v744_v59, 0.0 }
 0x14d   :  { %1159 = vst [vmem:[%s1551_s5 + $0x60] sm:$0xff] %v1131_v56   ;;  %v1141_v1 = vpack.c.bf16 %v774_v61, %v773_v60 }
 0x14e   :  { %1160 = vst [vmem:[%s1551_s5 + $0x68] sm:$0xff] %v1136_v62   ;;  %v1146_v2 = vpack.c.bf16 %v776_v0, %v775_v63 }
 0x14f   :  { %1161 = vst [vmem:[%s1551_s5 + $0x70] sm:$0xff] %v1141_v1  }
 0x150   :  { %1162 = vst [vmem:[%s1551_s5 + $0x78] sm:$0xff] %v1146_v2  }

</bundles_post_ra>
